<compile_context>
chip_gen: v7x
topology: tpu7x:2x2x1
jax: 0.10.0
libtpu: 0.0.40
codegen_flags: <defaults>
</compile_context>

<pallas_src>
import jax
import jax.numpy as jnp
from jax.experimental import pallas as pl
from jax.experimental.pallas import tpu as pltpu


def encoder_kernel(x_ref, wx_ref, w_ih_ref, w_hh_ref, b_ref, out_w_ref, out_h_ref):
    """Attention softmax + input weighting + LSTM recurrence in one kernel.

    Shapes:
      x     : (B, T-1, I)   driving series, native batch-major layout (f32)
      wx    : (1, T-1, 1)   x-part of the attn_linear weights (f32)
      w_ih  : (I, 4H)       lane-fused input->gate weights, gate order (i, f, g, o) (bf16)
      w_hh  : (H, 4H)       lane-fused hidden->gate weights (bf16)
      b     : (1, 4H)       b_ih + b_hh (f32)
      out_w : (B, T-1, I)   weighted inputs (f32)
      out_h : (B, T-1, H)   hidden states (f32)
    """
    B, Tm1, I = x_ref.shape
    H4 = w_hh_ref.shape[-1]
    H = H4 // 4

    x = x_ref[...]                                        # (B, T-1, I) f32
    wx = wx_ref[...]                                      # (1, T-1, 1) f32

    # ---- time-invariant input attention (exact, not an approximation) ----
    # The h/c/bias contributions of attn_linear are constant across the feature axis,
    # so they cancel under the feature-axis softmax; only the x-series part survives
    # and it is identical for every timestep and every recurrent state.
    x_score = jnp.sum(x * wx, axis=1)                     # (B, I)
    e = x_score - jnp.max(x_score, axis=1, keepdims=True)
    p = jnp.exp(e)
    attn = p * pl.reciprocal(jnp.sum(p, axis=1, keepdims=True), approx=True)  # (B, I)

    # Weighted input for every timestep at once; stored directly in batch-major layout.
    w_in_all = x * attn[:, None, :]                       # (B, T-1, I)
    out_w_ref[...] = w_in_all

    # ---- input-path gate pre-activations: ONE MXU push for all T-1 steps ----
    # Time-major ((T-1)*B, I) slab so per-step slices are contiguous rows.
    slab = jnp.concatenate([w_in_all[:, t, :] for t in range(Tm1)], axis=0)   # (T-1*B, I)
    x_proj = jnp.dot(slab.astype(jnp.bfloat16), w_ih_ref[...],
                     preferred_element_type=jnp.float32) + b_ref[...]         # (T-1*B, 4H)

    w_hh = w_hh_ref[...]                                  # (H, 4H) bf16
    h = jnp.zeros((B, H), jnp.float32)
    c = jnp.zeros((B, H), jnp.float32)

    # Fully-unrolled recurrence: per step one MXU push (h @ w_hh, bf16 operands / f32
    # accumulate), one sigmoid over the (B, 4H) block, tanh on the g slice and tanh(c).
    # Gate order (i, f, g, o) matches torch.nn.LSTM.
    for t in range(Tm1):
        gates = x_proj[t * B:(t + 1) * B, :] + jnp.dot(
            h.astype(jnp.bfloat16), w_hh, preferred_element_type=jnp.float32)  # (B, 4H)
        sg = jax.nn.sigmoid(gates)                        # i, f, (unused g), o in one pass
        i_g = sg[:, 0 * H:1 * H]
        f_g = sg[:, 1 * H:2 * H]
        o_g = sg[:, 3 * H:4 * H]
        g_g = jnp.tanh(gates[:, 2 * H:3 * H])
        c = f_g * c + i_g * g_g
        h = o_g * jnp.tanh(c)
        out_h_ref[:, pl.ds(t, 1), :] = h[:, None, :]      # hides under the MXU chain


@jax.jit
def encoder_forward(input_data, params):
    """input_data: (B, T-1, input_size) f32 -> (input_weighted, input_encoded)."""
    B, Tm1, I = input_data.shape
    H = params["w_hh"].shape[1]                           # torch w_hh: (4H, H)

    # attn_linear weight (1, 2H + T-1) is laid out [W_h | W_c | W_x] (torch.cat order in
    # the module's forward); only the x-series part can affect the feature-axis softmax.
    assert params["attn_w"].shape[1] == 2 * H + Tm1, "attn_linear layout changed"
    wx = params["attn_w"][:, 2 * H:].reshape(1, Tm1, 1)   # (1, T-1, 1)

    # LSTM weights: torch (4H, in), gate order (i, f, g, o) -> lane-fused (in, 4H)
    # bf16 MXU operands (f32 accumulation happens in-kernel).
    w_ih = params["w_ih"].T.astype(jnp.bfloat16)          # (I, 4H)
    w_hh = params["w_hh"].T.astype(jnp.bfloat16)          # (H, 4H)
    bias = (params["b_ih"] + params["b_hh"]).reshape(1, 4 * H).astype(jnp.float32)

    vmem = pl.BlockSpec(memory_space=pltpu.MemorySpace.VMEM)
    out_w, out_h = pl.pallas_call(
        encoder_kernel,
        out_shape=(jax.ShapeDtypeStruct((B, Tm1, I), jnp.float32),
                   jax.ShapeDtypeStruct((B, Tm1, H), jnp.float32)),
        in_specs=[vmem, vmem, vmem, vmem, vmem],
        out_specs=(vmem, vmem),
    )(input_data, wx, w_ih, w_hh, bias)
    return out_w, out_h


def encoder_forward_ref(input_data, params):
    """Pure-JAX reference mirroring the PyTorch forward exactly (incl. h/c in attention)."""
    B, Tm1, I = input_data.shape
    H = params["w_hh"].shape[1]
    attn_w, attn_b = params["attn_w"], params["attn_b"]
    w_ih, w_hh = params["w_ih"], params["w_hh"]
    b = params["b_ih"] + params["b_hh"]
    h = jnp.zeros((B, H), jnp.float32)
    c = jnp.zeros((B, H), jnp.float32)
    ws, hs = [], []
    x_att = jnp.transpose(input_data, (0, 2, 1))          # (B, I, T-1)
    for t in range(Tm1):
        feat = jnp.concatenate(
            [jnp.broadcast_to(h[:, None, :], (B, I, H)),
             jnp.broadcast_to(c[:, None, :], (B, I, H)),
             x_att], axis=2)                              # (B, I, 2H+T-1)
        e = (feat.reshape(-1, 2 * H + Tm1) @ attn_w.T + attn_b).reshape(B, I)
        attn = jax.nn.softmax(e, axis=1)
        w_in = attn * input_data[:, t, :]
        gates = w_in @ w_ih.T + h @ w_hh.T + b
        i_g = jax.nn.sigmoid(gates[:, 0:H])
        f_g = jax.nn.sigmoid(gates[:, H:2 * H])
        g_g = jnp.tanh(gates[:, 2 * H:3 * H])
        o_g = jax.nn.sigmoid(gates[:, 3 * H:4 * H])
        c = f_g * c + i_g * g_g
        h = o_g * jnp.tanh(c)
        ws.append(w_in)
        hs.append(h)
    return jnp.stack(ws, axis=1), jnp.stack(hs, axis=1)


if __name__ == "__main__":
    # Small shapes consistent with the module: Encoder(input_size=16, hidden_size=32, T=10)
    INPUT_SIZE, HIDDEN, T, BATCH = 16, 32, 10, 4

    key = jax.random.PRNGKey(0)
    k = jax.random.split(key, 7)
    scale = 1.0 / jnp.sqrt(HIDDEN)
    params = {
        "attn_w": jax.random.uniform(k[0], (1, 2 * HIDDEN + T - 1), jnp.float32, -scale, scale),
        "attn_b": jax.random.uniform(k[1], (1,), jnp.float32, -scale, scale),
        "w_ih": jax.random.uniform(k[2], (4 * HIDDEN, INPUT_SIZE), jnp.float32, -scale, scale),
        "w_hh": jax.random.uniform(k[3], (4 * HIDDEN, HIDDEN), jnp.float32, -scale, scale),
        "b_ih": jax.random.uniform(k[4], (4 * HIDDEN,), jnp.float32, -scale, scale),
        "b_hh": jax.random.uniform(k[5], (4 * HIDDEN,), jnp.float32, -scale, scale),
    }
    input_data = jax.random.normal(k[6], (BATCH, T - 1, INPUT_SIZE), jnp.float32)

    input_weighted, input_encoded = encoder_forward(input_data, params)
    jax.block_until_ready((input_weighted, input_encoded))

    ref_w, ref_h = encoder_forward_ref(input_data, params)
    assert input_weighted.shape == (BATCH, T - 1, INPUT_SIZE)
    assert input_encoded.shape == (BATCH, T - 1, HIDDEN)
    # Weighted inputs are f32 except the approx softmax reciprocal; hidden states also
    # carry bf16-operand matmul rounding compounded over the 9-step recurrence.
    assert jnp.allclose(input_weighted, ref_w, atol=5e-3, rtol=5e-3)
    assert jnp.allclose(input_encoded, ref_h, atol=2e-2, rtol=2e-2)

    print("KERNEL_OK")
</pallas_src>

<mosaic_0001>
module attributes {stable_mosaic.version = 11 : i64} {
  func.func @encoder_kernel(%arg0: memref<4x9x16xf32, #tpu.memory_space<vmem>>, %arg1: memref<1x9x1xf32, #tpu.memory_space<vmem>>, %arg2: memref<16x128xbf16, #tpu.memory_space<vmem>>, %arg3: memref<32x128xbf16, #tpu.memory_space<vmem>>, %arg4: memref<1x128xf32, #tpu.memory_space<vmem>>, %arg5: memref<4x9x16xf32, #tpu.memory_space<vmem>>, %arg6: memref<4x9x32xf32, #tpu.memory_space<vmem>>) attributes {dimension_semantics = [], scalar_prefetch = 0 : i64, scratch_operands = 0 : i64, tpu.core_type = #tpu.core_type<tc>} {
    %c0 = arith.constant 0 : index
    %c0_0 = arith.constant 0 : index
    %c0_1 = arith.constant 0 : index
    %0 = vector.load %arg0[%c0, %c0_0, %c0_1] : memref<4x9x16xf32, #tpu.memory_space<vmem>>, vector<4x9x16xf32>
    %c0_2 = arith.constant 0 : index
    %c0_3 = arith.constant 0 : index
    %c0_4 = arith.constant 0 : index
    %1 = vector.load %arg1[%c0_2, %c0_3, %c0_4] : memref<1x9x1xf32, #tpu.memory_space<vmem>>, vector<1x9x1xf32>
    %2 = vector.broadcast %1 : vector<1x9x1xf32> to vector<4x9x16xf32>
    %3 = arith.mulf %0, %2 : vector<4x9x16xf32>
    %cst = arith.constant dense<0.000000e+00> : vector<4x16xf32>
    %4 = vector.multi_reduction <add>, %3, %cst [1] : vector<4x9x16xf32> to vector<4x16xf32>
    %cst_5 = arith.constant dense<0xFF800000> : vector<4xf32>
    %5 = vector.multi_reduction <maximumf>, %4, %cst_5 [1] : vector<4x16xf32> to vector<4xf32>
    %6 = vector.shape_cast %5 : vector<4xf32> to vector<4x1xf32>
    %7 = vector.broadcast %6 : vector<4x1xf32> to vector<4x16xf32>
    %8 = arith.subf %4, %7 : vector<4x16xf32>
    %9 = math.exp %8 : vector<4x16xf32>
    %cst_6 = arith.constant dense<0.000000e+00> : vector<4xf32>
    %10 = vector.multi_reduction <add>, %9, %cst_6 [1] : vector<4x16xf32> to vector<4xf32>
    %11 = vector.shape_cast %10 : vector<4xf32> to vector<4x1xf32>
    %12 = tpu.reciprocal %11 {approx = true} : vector<4x1xf32> -> vector<4x1xf32>
    %13 = vector.broadcast %12 : vector<4x1xf32> to vector<4x16xf32>
    %14 = arith.mulf %9, %13 : vector<4x16xf32>
    %15 = vector.shape_cast %14 : vector<4x16xf32> to vector<4x1x16xf32>
    %16 = vector.broadcast %15 : vector<4x1x16xf32> to vector<4x9x16xf32>
    %17 = arith.mulf %0, %16 : vector<4x9x16xf32>
    %c0_7 = arith.constant 0 : index
    %c0_8 = arith.constant 0 : index
    %c0_9 = arith.constant 0 : index
    %18 = vector.load %arg5[%c0_7, %c0_8, %c0_9] : memref<4x9x16xf32, #tpu.memory_space<vmem>>, vector<4x9x16xf32>
    tpu.vector_store %arg5[%c0_7, %c0_8, %c0_9], %17 {strides = array<i32>} : memref<4x9x16xf32, #tpu.memory_space<vmem>>, vector<4x9x16xf32>,
    %19 = vector.extract_strided_slice %17 {offsets = [0, 0, 0], sizes = [4, 1, 16], strides = [1, 1, 1]} : vector<4x9x16xf32> to vector<4x1x16xf32>
    %20 = vector.shape_cast %19 : vector<4x1x16xf32> to vector<4x16xf32>
    %21 = vector.extract_strided_slice %17 {offsets = [0, 1, 0], sizes = [4, 1, 16], strides = [1, 1, 1]} : vector<4x9x16xf32> to vector<4x1x16xf32>
    %22 = vector.shape_cast %21 : vector<4x1x16xf32> to vector<4x16xf32>
    %23 = vector.extract_strided_slice %17 {offsets = [0, 2, 0], sizes = [4, 1, 16], strides = [1, 1, 1]} : vector<4x9x16xf32> to vector<4x1x16xf32>
    %24 = vector.shape_cast %23 : vector<4x1x16xf32> to vector<4x16xf32>
    %25 = vector.extract_strided_slice %17 {offsets = [0, 3, 0], sizes = [4, 1, 16], strides = [1, 1, 1]} : vector<4x9x16xf32> to vector<4x1x16xf32>
    %26 = vector.shape_cast %25 : vector<4x1x16xf32> to vector<4x16xf32>
    %27 = vector.extract_strided_slice %17 {offsets = [0, 4, 0], sizes = [4, 1, 16], strides = [1, 1, 1]} : vector<4x9x16xf32> to vector<4x1x16xf32>
    %28 = vector.shape_cast %27 : vector<4x1x16xf32> to vector<4x16xf32>
    %29 = vector.extract_strided_slice %17 {offsets = [0, 5, 0], sizes = [4, 1, 16], strides = [1, 1, 1]} : vector<4x9x16xf32> to vector<4x1x16xf32>
    %30 = vector.shape_cast %29 : vector<4x1x16xf32> to vector<4x16xf32>
    %31 = vector.extract_strided_slice %17 {offsets = [0, 6, 0], sizes = [4, 1, 16], strides = [1, 1, 1]} : vector<4x9x16xf32> to vector<4x1x16xf32>
    %32 = vector.shape_cast %31 : vector<4x1x16xf32> to vector<4x16xf32>
    %33 = vector.extract_strided_slice %17 {offsets = [0, 7, 0], sizes = [4, 1, 16], strides = [1, 1, 1]} : vector<4x9x16xf32> to vector<4x1x16xf32>
    %34 = vector.shape_cast %33 : vector<4x1x16xf32> to vector<4x16xf32>
    %35 = vector.extract_strided_slice %17 {offsets = [0, 8, 0], sizes = [4, 1, 16], strides = [1, 1, 1]} : vector<4x9x16xf32> to vector<4x1x16xf32>
    %36 = vector.shape_cast %35 : vector<4x1x16xf32> to vector<4x16xf32>
    %37 = tpu.concatenate %20, %22, %24, %26, %28, %30, %32, %34, %36 in 0 : vector<4x16xf32>, vector<4x16xf32>, vector<4x16xf32>, vector<4x16xf32>, vector<4x16xf32>, vector<4x16xf32>, vector<4x16xf32>, vector<4x16xf32>, vector<4x16xf32> -> vector<36x16xf32>
    %38 = arith.truncf %37 : vector<36x16xf32> to vector<36x16xbf16>
    %c0_10 = arith.constant 0 : index
    %c0_11 = arith.constant 0 : index
    %39 = vector.load %arg2[%c0_10, %c0_11] : memref<16x128xbf16, #tpu.memory_space<vmem>>, vector<16x128xbf16>
    %cst_12 = arith.constant dense<0.000000e+00> : vector<36x128xf32>
    %40 = tpu.matmul %38, %39, %cst_12 {dimension_numbers = #tpu.dot_dimension_numbers<[1], [0], [0], [1], [0, 0, 1, 1], [], []>} : vector<36x16xbf16>, vector<16x128xbf16>, vector<36x128xf32> -> vector<36x128xf32>
    %c0_13 = arith.constant 0 : index
    %c0_14 = arith.constant 0 : index
    %41 = vector.load %arg4[%c0_13, %c0_14] : memref<1x128xf32, #tpu.memory_space<vmem>>, vector<1x128xf32>
    %42 = vector.broadcast %41 : vector<1x128xf32> to vector<36x128xf32>
    %43 = arith.addf %40, %42 : vector<36x128xf32>
    %c0_15 = arith.constant 0 : index
    %c0_16 = arith.constant 0 : index
    %44 = vector.load %arg3[%c0_15, %c0_16] : memref<32x128xbf16, #tpu.memory_space<vmem>>, vector<32x128xbf16>
    %cst_17 = arith.constant 0.000000e+00 : f32
    %45 = vector.broadcast %cst_17 : f32 to vector<4x32xf32>
    %cst_18 = arith.constant 0.000000e+00 : f32
    %46 = vector.broadcast %cst_18 : f32 to vector<4x32xf32>
    %47 = vector.extract_strided_slice %43 {offsets = [0, 0], sizes = [4, 128], strides = [1, 1]} : vector<36x128xf32> to vector<4x128xf32>
    %48 = arith.truncf %45 : vector<4x32xf32> to vector<4x32xbf16>
    %cst_19 = arith.constant dense<0.000000e+00> : vector<4x128xf32>
    %49 = tpu.matmul %48, %44, %cst_19 {dimension_numbers = #tpu.dot_dimension_numbers<[1], [0], [0], [1], [0, 0, 1, 1], [], []>} : vector<4x32xbf16>, vector<32x128xbf16>, vector<4x128xf32> -> vector<4x128xf32>
    %50 = arith.addf %47, %49 : vector<4x128xf32>
    %51 = arith.negf %50 : vector<4x128xf32>
    %52 = math.exp %51 : vector<4x128xf32>
    %cst_20 = arith.constant 1.000000e+00 : f32
    %53 = vector.broadcast %cst_20 : f32 to vector<4x128xf32>
    %54 = arith.addf %53, %52 : vector<4x128xf32>
    %55 = arith.divf %53, %54 : vector<4x128xf32>
    %56 = vector.extract_strided_slice %55 {offsets = [0, 0], sizes = [4, 32], strides = [1, 1]} : vector<4x128xf32> to vector<4x32xf32>
    %57 = vector.extract_strided_slice %55 {offsets = [0, 32], sizes = [4, 32], strides = [1, 1]} : vector<4x128xf32> to vector<4x32xf32>
    %58 = vector.extract_strided_slice %55 {offsets = [0, 96], sizes = [4, 32], strides = [1, 1]} : vector<4x128xf32> to vector<4x32xf32>
    %59 = vector.extract_strided_slice %50 {offsets = [0, 64], sizes = [4, 32], strides = [1, 1]} : vector<4x128xf32> to vector<4x32xf32>
    %60 = math.tanh %59 : vector<4x32xf32>
    %61 = arith.mulf %57, %46 : vector<4x32xf32>
    %62 = arith.mulf %56, %60 : vector<4x32xf32>
    %63 = arith.addf %61, %62 : vector<4x32xf32>
    %64 = math.tanh %63 : vector<4x32xf32>
    %65 = arith.mulf %58, %64 : vector<4x32xf32>
    %66 = vector.shape_cast %65 : vector<4x32xf32> to vector<4x1x32xf32>
    %c0_21 = arith.constant 0 : index
    %c0_22 = arith.constant 0 : index
    %c0_23 = arith.constant 0 : index
    %67 = vector.load %arg6[%c0_21, %c0_22, %c0_23] : memref<4x9x32xf32, #tpu.memory_space<vmem>>, vector<4x1x32xf32>
    tpu.vector_store %arg6[%c0_21, %c0_22, %c0_23], %66 {strides = array<i32>} : memref<4x9x32xf32, #tpu.memory_space<vmem>>, vector<4x1x32xf32>,
    %68 = vector.extract_strided_slice %43 {offsets = [4, 0], sizes = [4, 128], strides = [1, 1]} : vector<36x128xf32> to vector<4x128xf32>
    %69 = arith.truncf %65 : vector<4x32xf32> to vector<4x32xbf16>
    %cst_24 = arith.constant dense<0.000000e+00> : vector<4x128xf32>
    %70 = tpu.matmul %69, %44, %cst_24 {dimension_numbers = #tpu.dot_dimension_numbers<[1], [0], [0], [1], [0, 0, 1, 1], [], []>} : vector<4x32xbf16>, vector<32x128xbf16>, vector<4x128xf32> -> vector<4x128xf32>
    %71 = arith.addf %68, %70 : vector<4x128xf32>
    %72 = arith.negf %71 : vector<4x128xf32>
    %73 = math.exp %72 : vector<4x128xf32>
    %cst_25 = arith.constant 1.000000e+00 : f32
    %74 = vector.broadcast %cst_25 : f32 to vector<4x128xf32>
    %75 = arith.addf %74, %73 : vector<4x128xf32>
    %76 = arith.divf %74, %75 : vector<4x128xf32>
    %77 = vector.extract_strided_slice %76 {offsets = [0, 0], sizes = [4, 32], strides = [1, 1]} : vector<4x128xf32> to vector<4x32xf32>
    %78 = vector.extract_strided_slice %76 {offsets = [0, 32], sizes = [4, 32], strides = [1, 1]} : vector<4x128xf32> to vector<4x32xf32>
    %79 = vector.extract_strided_slice %76 {offsets = [0, 96], sizes = [4, 32], strides = [1, 1]} : vector<4x128xf32> to vector<4x32xf32>
    %80 = vector.extract_strided_slice %71 {offsets = [0, 64], sizes = [4, 32], strides = [1, 1]} : vector<4x128xf32> to vector<4x32xf32>
    %81 = math.tanh %80 : vector<4x32xf32>
    %82 = arith.mulf %78, %63 : vector<4x32xf32>
    %83 = arith.mulf %77, %81 : vector<4x32xf32>
    %84 = arith.addf %82, %83 : vector<4x32xf32>
    %85 = math.tanh %84 : vector<4x32xf32>
    %86 = arith.mulf %79, %85 : vector<4x32xf32>
    %87 = vector.shape_cast %86 : vector<4x32xf32> to vector<4x1x32xf32>
    %c0_26 = arith.constant 0 : index
    %c1 = arith.constant 1 : index
    %c0_27 = arith.constant 0 : index
    %88 = vector.load %arg6[%c0_26, %c1, %c0_27] : memref<4x9x32xf32, #tpu.memory_space<vmem>>, vector<4x1x32xf32>
    tpu.vector_store %arg6[%c0_26, %c1, %c0_27], %87 {strides = array<i32>} : memref<4x9x32xf32, #tpu.memory_space<vmem>>, vector<4x1x32xf32>,
    %89 = vector.extract_strided_slice %43 {offsets = [8, 0], sizes = [4, 128], strides = [1, 1]} : vector<36x128xf32> to vector<4x128xf32>
    %90 = arith.truncf %86 : vector<4x32xf32> to vector<4x32xbf16>
    %cst_28 = arith.constant dense<0.000000e+00> : vector<4x128xf32>
    %91 = tpu.matmul %90, %44, %cst_28 {dimension_numbers = #tpu.dot_dimension_numbers<[1], [0], [0], [1], [0, 0, 1, 1], [], []>} : vector<4x32xbf16>, vector<32x128xbf16>, vector<4x128xf32> -> vector<4x128xf32>
    %92 = arith.addf %89, %91 : vector<4x128xf32>
    %93 = arith.negf %92 : vector<4x128xf32>
    %94 = math.exp %93 : vector<4x128xf32>
    %cst_29 = arith.constant 1.000000e+00 : f32
    %95 = vector.broadcast %cst_29 : f32 to vector<4x128xf32>
    %96 = arith.addf %95, %94 : vector<4x128xf32>
    %97 = arith.divf %95, %96 : vector<4x128xf32>
    %98 = vector.extract_strided_slice %97 {offsets = [0, 0], sizes = [4, 32], strides = [1, 1]} : vector<4x128xf32> to vector<4x32xf32>
    %99 = vector.extract_strided_slice %97 {offsets = [0, 32], sizes = [4, 32], strides = [1, 1]} : vector<4x128xf32> to vector<4x32xf32>
    %100 = vector.extract_strided_slice %97 {offsets = [0, 96], sizes = [4, 32], strides = [1, 1]} : vector<4x128xf32> to vector<4x32xf32>
    %101 = vector.extract_strided_slice %92 {offsets = [0, 64], sizes = [4, 32], strides = [1, 1]} : vector<4x128xf32> to vector<4x32xf32>
    %102 = math.tanh %101 : vector<4x32xf32>
    %103 = arith.mulf %99, %84 : vector<4x32xf32>
    %104 = arith.mulf %98, %102 : vector<4x32xf32>
    %105 = arith.addf %103, %104 : vector<4x32xf32>
    %106 = math.tanh %105 : vector<4x32xf32>
    %107 = arith.mulf %100, %106 : vector<4x32xf32>
    %108 = vector.shape_cast %107 : vector<4x32xf32> to vector<4x1x32xf32>
    %c0_30 = arith.constant 0 : index
    %c2 = arith.constant 2 : index
    %c0_31 = arith.constant 0 : index
    %109 = vector.load %arg6[%c0_30, %c2, %c0_31] : memref<4x9x32xf32, #tpu.memory_space<vmem>>, vector<4x1x32xf32>
    tpu.vector_store %arg6[%c0_30, %c2, %c0_31], %108 {strides = array<i32>} : memref<4x9x32xf32, #tpu.memory_space<vmem>>, vector<4x1x32xf32>,
    %110 = vector.extract_strided_slice %43 {offsets = [12, 0], sizes = [4, 128], strides = [1, 1]} : vector<36x128xf32> to vector<4x128xf32>
    %111 = arith.truncf %107 : vector<4x32xf32> to vector<4x32xbf16>
    %cst_32 = arith.constant dense<0.000000e+00> : vector<4x128xf32>
    %112 = tpu.matmul %111, %44, %cst_32 {dimension_numbers = #tpu.dot_dimension_numbers<[1], [0], [0], [1], [0, 0, 1, 1], [], []>} : vector<4x32xbf16>, vector<32x128xbf16>, vector<4x128xf32> -> vector<4x128xf32>
    %113 = arith.addf %110, %112 : vector<4x128xf32>
    %114 = arith.negf %113 : vector<4x128xf32>
    %115 = math.exp %114 : vector<4x128xf32>
    %cst_33 = arith.constant 1.000000e+00 : f32
    %116 = vector.broadcast %cst_33 : f32 to vector<4x128xf32>
    %117 = arith.addf %116, %115 : vector<4x128xf32>
    %118 = arith.divf %116, %117 : vector<4x128xf32>
    %119 = vector.extract_strided_slice %118 {offsets = [0, 0], sizes = [4, 32], strides = [1, 1]} : vector<4x128xf32> to vector<4x32xf32>
    %120 = vector.extract_strided_slice %118 {offsets = [0, 32], sizes = [4, 32], strides = [1, 1]} : vector<4x128xf32> to vector<4x32xf32>
    %121 = vector.extract_strided_slice %118 {offsets = [0, 96], sizes = [4, 32], strides = [1, 1]} : vector<4x128xf32> to vector<4x32xf32>
    %122 = vector.extract_strided_slice %113 {offsets = [0, 64], sizes = [4, 32], strides = [1, 1]} : vector<4x128xf32> to vector<4x32xf32>
    %123 = math.tanh %122 : vector<4x32xf32>
    %124 = arith.mulf %120, %105 : vector<4x32xf32>
    %125 = arith.mulf %119, %123 : vector<4x32xf32>
    %126 = arith.addf %124, %125 : vector<4x32xf32>
    %127 = math.tanh %126 : vector<4x32xf32>
    %128 = arith.mulf %121, %127 : vector<4x32xf32>
    %129 = vector.shape_cast %128 : vector<4x32xf32> to vector<4x1x32xf32>
    %c0_34 = arith.constant 0 : index
    %c3 = arith.constant 3 : index
    %c0_35 = arith.constant 0 : index
    %130 = vector.load %arg6[%c0_34, %c3, %c0_35] : memref<4x9x32xf32, #tpu.memory_space<vmem>>, vector<4x1x32xf32>
    tpu.vector_store %arg6[%c0_34, %c3, %c0_35], %129 {strides = array<i32>} : memref<4x9x32xf32, #tpu.memory_space<vmem>>, vector<4x1x32xf32>,
    %131 = vector.extract_strided_slice %43 {offsets = [16, 0], sizes = [4, 128], strides = [1, 1]} : vector<36x128xf32> to vector<4x128xf32>
    %132 = arith.truncf %128 : vector<4x32xf32> to vector<4x32xbf16>
    %cst_36 = arith.constant dense<0.000000e+00> : vector<4x128xf32>
    %133 = tpu.matmul %132, %44, %cst_36 {dimension_numbers = #tpu.dot_dimension_numbers<[1], [0], [0], [1], [0, 0, 1, 1], [], []>} : vector<4x32xbf16>, vector<32x128xbf16>, vector<4x128xf32> -> vector<4x128xf32>
    %134 = arith.addf %131, %133 : vector<4x128xf32>
    %135 = arith.negf %134 : vector<4x128xf32>
    %136 = math.exp %135 : vector<4x128xf32>
    %cst_37 = arith.constant 1.000000e+00 : f32
    %137 = vector.broadcast %cst_37 : f32 to vector<4x128xf32>
    %138 = arith.addf %137, %136 : vector<4x128xf32>
    %139 = arith.divf %137, %138 : vector<4x128xf32>
    %140 = vector.extract_strided_slice %139 {offsets = [0, 0], sizes = [4, 32], strides = [1, 1]} : vector<4x128xf32> to vector<4x32xf32>
    %141 = vector.extract_strided_slice %139 {offsets = [0, 32], sizes = [4, 32], strides = [1, 1]} : vector<4x128xf32> to vector<4x32xf32>
    %142 = vector.extract_strided_slice %139 {offsets = [0, 96], sizes = [4, 32], strides = [1, 1]} : vector<4x128xf32> to vector<4x32xf32>
    %143 = vector.extract_strided_slice %134 {offsets = [0, 64], sizes = [4, 32], strides = [1, 1]} : vector<4x128xf32> to vector<4x32xf32>
    %144 = math.tanh %143 : vector<4x32xf32>
    %145 = arith.mulf %141, %126 : vector<4x32xf32>
    %146 = arith.mulf %140, %144 : vector<4x32xf32>
    %147 = arith.addf %145, %146 : vector<4x32xf32>
    %148 = math.tanh %147 : vector<4x32xf32>
    %149 = arith.mulf %142, %148 : vector<4x32xf32>
    %150 = vector.shape_cast %149 : vector<4x32xf32> to vector<4x1x32xf32>
    %c0_38 = arith.constant 0 : index
    %c4 = arith.constant 4 : index
    %c0_39 = arith.constant 0 : index
    %151 = vector.load %arg6[%c0_38, %c4, %c0_39] : memref<4x9x32xf32, #tpu.memory_space<vmem>>, vector<4x1x32xf32>
    tpu.vector_store %arg6[%c0_38, %c4, %c0_39], %150 {strides = array<i32>} : memref<4x9x32xf32, #tpu.memory_space<vmem>>, vector<4x1x32xf32>,
    %152 = vector.extract_strided_slice %43 {offsets = [20, 0], sizes = [4, 128], strides = [1, 1]} : vector<36x128xf32> to vector<4x128xf32>
    %153 = arith.truncf %149 : vector<4x32xf32> to vector<4x32xbf16>
    %cst_40 = arith.constant dense<0.000000e+00> : vector<4x128xf32>
    %154 = tpu.matmul %153, %44, %cst_40 {dimension_numbers = #tpu.dot_dimension_numbers<[1], [0], [0], [1], [0, 0, 1, 1], [], []>} : vector<4x32xbf16>, vector<32x128xbf16>, vector<4x128xf32> -> vector<4x128xf32>
    %155 = arith.addf %152, %154 : vector<4x128xf32>
    %156 = arith.negf %155 : vector<4x128xf32>
    %157 = math.exp %156 : vector<4x128xf32>
    %cst_41 = arith.constant 1.000000e+00 : f32
    %158 = vector.broadcast %cst_41 : f32 to vector<4x128xf32>
    %159 = arith.addf %158, %157 : vector<4x128xf32>
    %160 = arith.divf %158, %159 : vector<4x128xf32>
    %161 = vector.extract_strided_slice %160 {offsets = [0, 0], sizes = [4, 32], strides = [1, 1]} : vector<4x128xf32> to vector<4x32xf32>
    %162 = vector.extract_strided_slice %160 {offsets = [0, 32], sizes = [4, 32], strides = [1, 1]} : vector<4x128xf32> to vector<4x32xf32>
    %163 = vector.extract_strided_slice %160 {offsets = [0, 96], sizes = [4, 32], strides = [1, 1]} : vector<4x128xf32> to vector<4x32xf32>
    %164 = vector.extract_strided_slice %155 {offsets = [0, 64], sizes = [4, 32], strides = [1, 1]} : vector<4x128xf32> to vector<4x32xf32>
    %165 = math.tanh %164 : vector<4x32xf32>
    %166 = arith.mulf %162, %147 : vector<4x32xf32>
    %167 = arith.mulf %161, %165 : vector<4x32xf32>
    %168 = arith.addf %166, %167 : vector<4x32xf32>
    %169 = math.tanh %168 : vector<4x32xf32>
    %170 = arith.mulf %163, %169 : vector<4x32xf32>
    %171 = vector.shape_cast %170 : vector<4x32xf32> to vector<4x1x32xf32>
    %c0_42 = arith.constant 0 : index
    %c5 = arith.constant 5 : index
    %c0_43 = arith.constant 0 : index
    %172 = vector.load %arg6[%c0_42, %c5, %c0_43] : memref<4x9x32xf32, #tpu.memory_space<vmem>>, vector<4x1x32xf32>
    tpu.vector_store %arg6[%c0_42, %c5, %c0_43], %171 {strides = array<i32>} : memref<4x9x32xf32, #tpu.memory_space<vmem>>, vector<4x1x32xf32>,
    %173 = vector.extract_strided_slice %43 {offsets = [24, 0], sizes = [4, 128], strides = [1, 1]} : vector<36x128xf32> to vector<4x128xf32>
    %174 = arith.truncf %170 : vector<4x32xf32> to vector<4x32xbf16>
    %cst_44 = arith.constant dense<0.000000e+00> : vector<4x128xf32>
    %175 = tpu.matmul %174, %44, %cst_44 {dimension_numbers = #tpu.dot_dimension_numbers<[1], [0], [0], [1], [0, 0, 1, 1], [], []>} : vector<4x32xbf16>, vector<32x128xbf16>, vector<4x128xf32> -> vector<4x128xf32>
    %176 = arith.addf %173, %175 : vector<4x128xf32>
    %177 = arith.negf %176 : vector<4x128xf32>
    %178 = math.exp %177 : vector<4x128xf32>
    %cst_45 = arith.constant 1.000000e+00 : f32
    %179 = vector.broadcast %cst_45 : f32 to vector<4x128xf32>
    %180 = arith.addf %179, %178 : vector<4x128xf32>
    %181 = arith.divf %179, %180 : vector<4x128xf32>
    %182 = vector.extract_strided_slice %181 {offsets = [0, 0], sizes = [4, 32], strides = [1, 1]} : vector<4x128xf32> to vector<4x32xf32>
    %183 = vector.extract_strided_slice %181 {offsets = [0, 32], sizes = [4, 32], strides = [1, 1]} : vector<4x128xf32> to vector<4x32xf32>
    %184 = vector.extract_strided_slice %181 {offsets = [0, 96], sizes = [4, 32], strides = [1, 1]} : vector<4x128xf32> to vector<4x32xf32>
    %185 = vector.extract_strided_slice %176 {offsets = [0, 64], sizes = [4, 32], strides = [1, 1]} : vector<4x128xf32> to vector<4x32xf32>
    %186 = math.tanh %185 : vector<4x32xf32>
    %187 = arith.mulf %183, %168 : vector<4x32xf32>
    %188 = arith.mulf %182, %186 : vector<4x32xf32>
    %189 = arith.addf %187, %188 : vector<4x32xf32>
    %190 = math.tanh %189 : vector<4x32xf32>
    %191 = arith.mulf %184, %190 : vector<4x32xf32>
    %192 = vector.shape_cast %191 : vector<4x32xf32> to vector<4x1x32xf32>
    %c0_46 = arith.constant 0 : index
    %c6 = arith.constant 6 : index
    %c0_47 = arith.constant 0 : index
    %193 = vector.load %arg6[%c0_46, %c6, %c0_47] : memref<4x9x32xf32, #tpu.memory_space<vmem>>, vector<4x1x32xf32>
    tpu.vector_store %arg6[%c0_46, %c6, %c0_47], %192 {strides = array<i32>} : memref<4x9x32xf32, #tpu.memory_space<vmem>>, vector<4x1x32xf32>,
    %194 = vector.extract_strided_slice %43 {offsets = [28, 0], sizes = [4, 128], strides = [1, 1]} : vector<36x128xf32> to vector<4x128xf32>
    %195 = arith.truncf %191 : vector<4x32xf32> to vector<4x32xbf16>
    %cst_48 = arith.constant dense<0.000000e+00> : vector<4x128xf32>
    %196 = tpu.matmul %195, %44, %cst_48 {dimension_numbers = #tpu.dot_dimension_numbers<[1], [0], [0], [1], [0, 0, 1, 1], [], []>} : vector<4x32xbf16>, vector<32x128xbf16>, vector<4x128xf32> -> vector<4x128xf32>
    %197 = arith.addf %194, %196 : vector<4x128xf32>
    %198 = arith.negf %197 : vector<4x128xf32>
    %199 = math.exp %198 : vector<4x128xf32>
    %cst_49 = arith.constant 1.000000e+00 : f32
    %200 = vector.broadcast %cst_49 : f32 to vector<4x128xf32>
    %201 = arith.addf %200, %199 : vector<4x128xf32>
    %202 = arith.divf %200, %201 : vector<4x128xf32>
    %203 = vector.extract_strided_slice %202 {offsets = [0, 0], sizes = [4, 32], strides = [1, 1]} : vector<4x128xf32> to vector<4x32xf32>
    %204 = vector.extract_strided_slice %202 {offsets = [0, 32], sizes = [4, 32], strides = [1, 1]} : vector<4x128xf32> to vector<4x32xf32>
    %205 = vector.extract_strided_slice %202 {offsets = [0, 96], sizes = [4, 32], strides = [1, 1]} : vector<4x128xf32> to vector<4x32xf32>
    %206 = vector.extract_strided_slice %197 {offsets = [0, 64], sizes = [4, 32], strides = [1, 1]} : vector<4x128xf32> to vector<4x32xf32>
    %207 = math.tanh %206 : vector<4x32xf32>
    %208 = arith.mulf %204, %189 : vector<4x32xf32>
    %209 = arith.mulf %203, %207 : vector<4x32xf32>
    %210 = arith.addf %208, %209 : vector<4x32xf32>
    %211 = math.tanh %210 : vector<4x32xf32>
    %212 = arith.mulf %205, %211 : vector<4x32xf32>
    %213 = vector.shape_cast %212 : vector<4x32xf32> to vector<4x1x32xf32>
    %c0_50 = arith.constant 0 : index
    %c7 = arith.constant 7 : index
    %c0_51 = arith.constant 0 : index
    %214 = vector.load %arg6[%c0_50, %c7, %c0_51] : memref<4x9x32xf32, #tpu.memory_space<vmem>>, vector<4x1x32xf32>
    tpu.vector_store %arg6[%c0_50, %c7, %c0_51], %213 {strides = array<i32>} : memref<4x9x32xf32, #tpu.memory_space<vmem>>, vector<4x1x32xf32>,
    %215 = vector.extract_strided_slice %43 {offsets = [32, 0], sizes = [4, 128], strides = [1, 1]} : vector<36x128xf32> to vector<4x128xf32>
    %216 = arith.truncf %212 : vector<4x32xf32> to vector<4x32xbf16>
    %cst_52 = arith.constant dense<0.000000e+00> : vector<4x128xf32>
    %217 = tpu.matmul %216, %44, %cst_52 {dimension_numbers = #tpu.dot_dimension_numbers<[1], [0], [0], [1], [0, 0, 1, 1], [], []>} : vector<4x32xbf16>, vector<32x128xbf16>, vector<4x128xf32> -> vector<4x128xf32>
    %218 = arith.addf %215, %217 : vector<4x128xf32>
    %219 = arith.negf %218 : vector<4x128xf32>
    %220 = math.exp %219 : vector<4x128xf32>
    %cst_53 = arith.constant 1.000000e+00 : f32
    %221 = vector.broadcast %cst_53 : f32 to vector<4x128xf32>
    %222 = arith.addf %221, %220 : vector<4x128xf32>
    %223 = arith.divf %221, %222 : vector<4x128xf32>
    %224 = vector.extract_strided_slice %223 {offsets = [0, 0], sizes = [4, 32], strides = [1, 1]} : vector<4x128xf32> to vector<4x32xf32>
    %225 = vector.extract_strided_slice %223 {offsets = [0, 32], sizes = [4, 32], strides = [1, 1]} : vector<4x128xf32> to vector<4x32xf32>
    %226 = vector.extract_strided_slice %223 {offsets = [0, 96], sizes = [4, 32], strides = [1, 1]} : vector<4x128xf32> to vector<4x32xf32>
    %227 = vector.extract_strided_slice %218 {offsets = [0, 64], sizes = [4, 32], strides = [1, 1]} : vector<4x128xf32> to vector<4x32xf32>
    %228 = math.tanh %227 : vector<4x32xf32>
    %229 = arith.mulf %225, %210 : vector<4x32xf32>
    %230 = arith.mulf %224, %228 : vector<4x32xf32>
    %231 = arith.addf %229, %230 : vector<4x32xf32>
    %232 = math.tanh %231 : vector<4x32xf32>
    %233 = arith.mulf %226, %232 : vector<4x32xf32>
    %234 = vector.shape_cast %233 : vector<4x32xf32> to vector<4x1x32xf32>
    %c0_54 = arith.constant 0 : index
    %c8 = arith.constant 8 : index
    %c0_55 = arith.constant 0 : index
    %235 = vector.load %arg6[%c0_54, %c8, %c0_55] : memref<4x9x32xf32, #tpu.memory_space<vmem>>, vector<4x1x32xf32>
    tpu.vector_store %arg6[%c0_54, %c8, %c0_55], %234 {strides = array<i32>} : memref<4x9x32xf32, #tpu.memory_space<vmem>>, vector<4x1x32xf32>,
    return
  }
}

</mosaic_0001>

<bundles_post_ra>
// kernel: encoder_forward.1
= control target key start
LH: loop header
LB: loop body
LE: loop exit
PB: predicated region body
PF: predicated region fallthrough
CT: control target
= control target key end

     0   :  { %v1813_v0 = vmov 0   ;;  %vm51_vm0 = vcmask 130048   ;;  %vm53_vm1 = vcmask 122880   ;;  %vm93_vm2 = vcmask 1041409   ;;  %s1817_s11 = smov 32   ;;  %s2528_s1 = inlined_call_operand.vmem [shape: f32[1,9,1], index: 1, kind: input, shape index: {}]   ;;  %s2529_s0 = inlined_call_operand.vmem [shape: f32[4,9,16], index: 0, kind: input, shape index: {}]   ;;  %s2530_s2 = inlined_call_operand.vmem [shape: bf16[16,128], index: 2, kind: input, shape index: {}]   ;;  %s2531_s3 = inlined_call_operand.vmem [shape: bf16[32,128], index: 3, kind: input, shape index: {}]   ;;  %s2532_s5 = inlined_call_operand.vmem [shape: f32[4,9,16], index: 5, kind: output, shape index: {0}]   ;;  %s2533_s4 = inlined_call_operand.vmem [shape: f32[1,128], index: 4, kind: input, shape index: {}]   ;;  %s2534_s6 = inlined_call_operand.vmem [shape: f32[4,9,32], index: 6, kind: output, shape index: {1}]  }
   0x1   :  { %1727 = vset.pattern.permute.xlu0 %v1813_v0  ;;  %v31_v1 = vld [vmem:[%s2528_s1] sm:$0xff]  ;;  %v32_v2 = vld [vmem:[%s2528_s1 + $0x8] sm:$0x1]  ;;  %v1869_v4 = vld [vmem:[%s2529_s0 + $0x10] sm:$0xff]  ;;  %vm95_vm3 = vcmask 1042434   ;;  %vm97_vm4 = vcmask 1043459  }
   0x2   :  { %35 = vperm.xlu0 %1727, %v31_v1   ;;  %v1864_v3 = vld [vmem:[%s2529_s0] sm:$0xff]  ;;  %v1879_v6 = vld [vmem:[%s2529_s0 + $0x30] sm:$0xff]  ;;  %v1884_v8 = vld [vmem:[%s2529_s0 + $0x8] sm:$0x1]  ;;  %vm100_vm5 = vcmask 125952   ;;  %vm1815_vm6 = vmmov 0  }
   0x3   :  { %v1874_v5 = vld [vmem:[%s2529_s0 + $0x20] sm:$0xff]  ;;  %v1893_v13 = vld [vmem:[%s2529_s0 + $0x18] sm:$0x1]  ;;  %v1898_v14 = vld [vmem:[%s2529_s0 + $0x28] sm:$0x1]  ;;  %vm196_vm7 = vcmask 1045509  }
   0x4   :  { %v1903_v15 = vld [vmem:[%s2529_s0 + $0x38] sm:$0x1]  ;;  %vm199_vm8 = vcmask 1046534   ;;  %vm202_vm9 = vcmask 1047559   ;;  %vm261_vm10 = vcmask 1043456   ;;  %vm365_vm11 = vcmask 261120  }
   0x5   :  { %vm487_vm12 = vcmask 253952  }
   0x6   :  { %40 = vperm.xlu0 %1727, %v32_v2  }
  0x81   :  { %v36_v7 = vpop.permute.xlu0 %35 }
  0x82   :  { %v43_v9 = vmul.f32 %v36_v7, %v1864_v3  ;;  %v45_v10 = vmul.f32 %v36_v7, %v1869_v4  ;;  %v47_v11 = vmul.f32 %v36_v7, %v1874_v5  ;;  %v49_v12 = vmul.f32 %v36_v7, %v1879_v6 }
  0x84   :  { %v52_v21 = vsel %vm51_vm0, %v43_v9, 0.0  ;;  %v62_v22 = vsel %vm51_vm0, %v45_v10, 0.0  ;;  %v71_v23 = vsel %vm51_vm0, %v47_v11, 0.0  ;;  %v80_v24 = vsel %vm51_vm0, %v49_v12, 0.0 }
  0x85   :  { %v41_v16 = vpop.permute.xlu0 %40 }
  0x86   :  { %v44_v17 = vmul.f32 %v41_v16, %v1884_v8  ;;  %v46_v18 = vmul.f32 %v41_v16, %v1893_v13  ;;  %v48_v19 = vmul.f32 %v41_v16, %v1898_v14  ;;  %v50_v20 = vmul.f32 %v41_v16, %v1903_v15 }
  0x88   :  { %v54_v25 = vsel %vm53_vm1, %v44_v17, 0.0  ;;  %v63_v26 = vsel %vm53_vm1, %v46_v18, 0.0  ;;  %v72_v27 = vsel %vm53_vm1, %v48_v19, 0.0  ;;  %v81_v28 = vsel %vm53_vm1, %v50_v20, 0.0 }
  0x89   :  { %v55_v29 = vadd.f32 %v54_v25, %v52_v21  ;;  %v64_v30 = vadd.f32 %v63_v26, %v62_v22  ;;  %v73_v31 = vadd.f32 %v72_v27, %v71_v23  ;;  %v82_v32 = vadd.f32 %v81_v28, %v80_v24 }
  0x8b   :  { %v56_v33 = vrot.slane %v55_v29, 4  ;;  %v65_v34 = vrot.slane %v64_v30, 4  ;;  %v74_v35 = vrot.slane %v73_v31, 4  ;;  %v83_v36 = vrot.slane %v82_v32, 4 }
  0x8d   :  { %v57_v37 = vadd.f32 %v56_v33, %v55_v29  ;;  %v66_v38 = vadd.f32 %v65_v34, %v64_v30  ;;  %v75_v39 = vadd.f32 %v74_v35, %v73_v31  ;;  %v84_v40 = vadd.f32 %v83_v36, %v82_v32  ;;  %v1728_v30 = vld [vmem:[%s2530_s2] sm:$0xff]  }
  0x8e   :  { %v1814_v29 = vmov 0.0   ;;  %v151_v32 = vlaneseq }
  0x8f   :  { %v58_v41 = vrot.slane %v57_v37, 2  ;;  %v67_v42 = vrot.slane %v66_v38, 2  ;;  %v76_v43 = vrot.slane %v75_v39, 2  ;;  %v85_v44 = vrot.slane %v84_v40, 2  ;;  %1717 = vmatprep.subr.bf16.mxu1 %v1814_v29  ;;  %1631 = vmatprep.subr.bf16.mxu0 %v1814_v29 }
  0x90   :  { %1641 = vmatprep.mubr.msk.bf16.mxu1 %vm1815_vm6, %v1814_v29  ;;  %1633 = vmatprep.mubr.msk.bf16.mxu0 %vm1815_vm6, %v1814_v29  ;;  %v1936_v33 = vshrl.u32 %v151_v32, 7 }
  0x91   :  { %v59_v45 = vadd.f32 %v58_v41, %v57_v37  ;;  %v68_v46 = vadd.f32 %v67_v42, %v66_v38  ;;  %v77_v47 = vadd.f32 %v76_v43, %v75_v39  ;;  %v86_v48 = vadd.f32 %v85_v44, %v84_v40  ;;  %1718 = vmatpush3.bf16.msra.mxu1 %v1728_v30 }
  0x92   :  { %1632 = vmatpush3.bf16.msra.mxu0 %v1728_v30  ;;  %1645 = vmatprep.subr.bf16.mxu1 %v1814_v29  ;;  %v1939_v34 = vsub.s32 0, %v1936_v33 }
  0x93   :  { %v60_v49 = vrot.slane %v59_v45, 1  ;;  %v69_v50 = vrot.slane %v68_v46, 1  ;;  %v78_v51 = vrot.slane %v77_v47, 1  ;;  %v87_v52 = vrot.slane %v86_v48, 1  ;;  %1669 = vmatprep.subr.bf16.mxu0 %v1814_v29 }
  0x95   :  { %v61_v53 = vadd.f32 %v60_v49, %v59_v45  ;;  %v70_v54 = vadd.f32 %v69_v50, %v68_v46  ;;  %v79_v55 = vadd.f32 %v78_v51, %v77_v47  ;;  %v88_v56 = vadd.f32 %v87_v52, %v86_v48 }
  0x97   :  { %v94_v57 = vsel %vm93_vm2, %v70_v54, %v61_v53 }
  0x98   :  { %v96_v58 = vsel %vm95_vm3, %v79_v55, %v94_v57 }
  0x99   :  { %v98_v59 = vsel %vm97_vm4, %v88_v56, %v96_v58 }
  0x9a   :  { %v101_v60 = vsel %vm100_vm5, %v98_v59, -inf }
  0x9b   :  { %102 = vmax.xlane.f32.xlu1 %v101_v60 }
 0x128   :  { %v103_v61 = vpop.xlane.xlu1 %102 }
 0x129   :  { %v105_v62 = vrot.slane %v103_v61, 1  ;;  %v106_v63 = vrot.slane %v103_v61, 2  ;;  %v107_v1 = vrot.slane %v103_v61, 3  ;;  %v112_v2 = vsub.f32 %v61_v53, %v103_v61 }
 0x12b   :  { %v113_v7 = vsub.f32 %v70_v54, %v105_v62  ;;  %v114_v9 = vsub.f32 %v79_v55, %v106_v63  ;;  %v115_v10 = vsub.f32 %v88_v56, %v107_v1  ;;  %v116_v11 = vmul.f32 1.442695, %v112_v2  ;;  %v2015_v1 = vld [vmem:[%s2531_s3] sm:$0xff]  }
 0x12d   :  { %v118_v12 = vmul.f32 1.442695, %v113_v7  ;;  %v120_v16 = vmul.f32 1.442695, %v114_v9  ;;  %v122_v17 = vmul.f32 1.442695, %v115_v10  ;;  %1731 = vpow2.f32 %v116_v11 }
 0x12f   :  { %1733 = vpow2.f32 %v118_v12 }
 0x130   :  { %1735 = vpow2.f32 %v120_v16 }
 0x131   :  { %1737 = vpow2.f32 %v122_v17 }
 0x137   :  { %v1732_v18 = vpop.eup %1731 }
 0x139   :  { %v1734_v19 = vpop.eup %1733 }
 0x13a   :  { %v1736_v20 = vpop.eup %1735  ;;  %v128_v21 = vrot.slane %v1734_v19, 7 }
 0x13b   :  { %v1738_v22 = vpop.eup %1737  ;;  %v130_v23 = vrot.slane %v1736_v20, 6 }
 0x13c   :  { %v129_v24 = vsel %vm93_vm2, %v128_v21, %v1732_v18  ;;  %v132_v25 = vrot.slane %v1738_v22, 5 }
 0x13d   :  { %v131_v26 = vsel %vm95_vm3, %v130_v23, %v129_v24 }
 0x13e   :  { %v133_v27 = vsel %vm97_vm4, %v132_v25, %v131_v26 }
 0x13f   :  { %v135_v28 = vsel %vm100_vm5, %v133_v27, 0.0  ;;  %v2039_v27 = vld [vmem:[%s2531_s3 + $0x8] sm:$0xff]  }
 0x140   :  { %136 = vadd.xlane.f32.xlu1 %v135_v28 }
 0x1cd   :  { %v137_v31 = vpop.xlane.xlu1 %136 }
 0x1ce   :  { %1739 = vrcp.f32 %v137_v31 }
 0x1d8   :  { %v1740_v35 = vpop.eup %1739 }
 0x1d9   :  { %v140_v36 = vrot.slane %v1740_v35, 1  ;;  %v141_v37 = vrot.slane %v1740_v35, 2  ;;  %v142_v38 = vrot.slane %v1740_v35, 3  ;;  %v147_v39 = vmul.f32 %v1740_v35, %v1732_v18 }
 0x1db   :  { %v148_v40 = vmul.f32 %v1734_v19, %v140_v36  ;;  %v149_v41 = vmul.f32 %v1736_v20, %v141_v37  ;;  %v150_v42 = vmul.f32 %v1738_v22, %v142_v38  ;;  %v154_v43 = vrot.slane %v147_v39, %v1939_v34 }
 0x1dd   :  { %v158_v44 = vrot.slane %v148_v40, %v1939_v34  ;;  %v162_v45 = vrot.slane %v149_v41, %v1939_v34  ;;  %v166_v46 = vrot.slane %v150_v42, %v1939_v34  ;;  %v1946_v47 = vmul.f32 %v154_v43, %v1864_v3 }
 0x1de   :  { %v168_v48 = vmul.f32 %v154_v43, %v1884_v8 }
 0x1df   :  { %v1950_v49 = vmul.f32 %v158_v44, %v1869_v4  ;;  %v170_v50 = vmul.f32 %v158_v44, %v1893_v13  ;;  %v1954_v51 = vmul.f32 %v162_v45, %v1874_v5  ;;  %v172_v52 = vmul.f32 %v162_v45, %v1898_v14  ;;  %175 = vst.msk [vmem:[%s2532_s5] sm:$0xff] %vm51_vm0, %v1946_v47 }
 0x1e0   :  { %v1963_v3 = vmul.f32 %v166_v46, %v1879_v6  ;;  %v174_v8 = vmul.f32 %v166_v46, %v1903_v15  ;;  %176 = vst.msk [vmem:[%s2532_s5 + $0x8] sm:$0x1] %vm53_vm1, %v168_v48  ;;  %v194_v14 = vrot.slane %v1946_v47, 5  ;;  %v205_v54 = vrot.slane %v1946_v47, 2 }
 0x1e1   :  { %177 = vst.msk [vmem:[%s2532_s5 + $0x10] sm:$0xff] %vm51_vm0, %v1950_v49  ;;  %179 = vst.msk [vmem:[%s2532_s5 + $0x20] sm:$0xff] %vm51_vm0, %v1954_v51  ;;  %v254_v4 = vrot.slane %v170_v50, 7  ;;  %v256_v5 = vrot.slane %v172_v52, 6  ;;  %v187_v6 = vrot.slane %v1950_v49, 7  ;;  %v189_v13 = vrot.slane %v1954_v51, 6 }
 0x1e2   :  { %178 = vst.msk [vmem:[%s2532_s5 + $0x18] sm:$0x1] %vm53_vm1, %v170_v50  ;;  %180 = vst.msk [vmem:[%s2532_s5 + $0x28] sm:$0x1] %vm53_vm1, %v172_v52  ;;  %v195_v15 = vrot.slane %v1950_v49, 4  ;;  %v198_v53 = vrot.slane %v1954_v51, 3 }
 0x1e3   :  { %181 = vst.msk [vmem:[%s2532_s5 + $0x30] sm:$0xff] %vm51_vm0, %v1963_v3  ;;  %v255_v55 = vsel %vm93_vm2, %v254_v4, %v168_v48  ;;  %v258_v56 = vrot.slane %v174_v8, 5  ;;  %v188_v57 = vsel %vm93_vm2, %v187_v6, %v1946_v47  ;;  %v206_v58 = vrot.slane %v1950_v49, 1 }
 0x1e4   :  { %182 = vst.msk [vmem:[%s2532_s5 + $0x38] sm:$0x1] %vm53_vm1, %v174_v8  ;;  %v257_v59 = vsel %vm95_vm3, %v256_v5, %v255_v55  ;;  %v190_v60 = vsel %vm95_vm3, %v189_v13, %v188_v57  ;;  %v191_v61 = vrot.slane %v1963_v3, 5  ;;  %v197_v62 = vsel %vm196_vm7, %v195_v15, %v194_v14 }
 0x1e5   :  { %v259_v63 = vsel %vm97_vm4, %v258_v56, %v257_v59  ;;  %v200_v2 = vsel %vm199_vm8, %v198_v53, %v197_v62  ;;  %v201_v7 = vrot.slane %v1963_v3, 2  ;;  %v207_v9 = vsel %vm93_vm2, %v206_v58, %v205_v54 }
 0x1e6   :  { %v268_v10 = vpack.c.bf16 %v259_v63, %v259_v63  ;;  %v192_v11 = vsel %vm97_vm4, %v191_v61, %v190_v60  ;;  %v208_v12 = vsel %vm95_vm3, %v1954_v51, %v207_v9  ;;  %v209_v16 = vrot.slane %v1963_v3, 7 }
 0x1e7   :  { %v203_v17 = vsel %vm202_vm9, %v201_v7, %v200_v2  ;;  %v212_v18 = vrot.slane %v1946_v47, 7  ;;  %v213_v19 = vrot.slane %v1950_v49, 6  ;;  %v215_v20 = vrot.slane %v1954_v51, 5 }
 0x1e8   :  { %1642 = vmatmul.mubr.msk.bf16.vlgmr.msra.gmra.mrb[0].mxu1 %vm51_vm0, %v268_v10  ;;  %v210_v21 = vsel %vm97_vm4, %v209_v16, %v208_v12  ;;  %v220_v22 = vrot.slane %v1946_v47, 4  ;;  %v221_v23 = vrot.slane %v1950_v49, 3  ;;  %v223_v24 = vrot.slane %v1954_v51, 2 }
 0x1e9   :  { %1646 = vmatpush3.bf16.msra.mxu1 %v2015_v1  ;;  %v214_v25 = vsel %vm196_vm7, %v213_v19, %v212_v18  ;;  %v217_v26 = vrot.slane %v1963_v3, 4  ;;  %1649 = vmatprep.mubr.msk.bf16.mxu1 %vm1815_vm6, %v1814_v29  ;;  %v228_v28 = vrot.slane %v1946_v47, 1  ;;  %v230_v30 = vrot.slane %v1954_v51, 7 }
 0x1ea   :  { %v216_v31 = vsel %vm199_vm8, %v215_v20, %v214_v25  ;;  %v262_v32 = vsel %vm261_vm10, %v192_v11, %v203_v17  ;;  %1647 = vmatprep.subr.bf16.mxu1 %v1814_v29  ;;  %v222_v35 = vsel %vm93_vm2, %v221_v23, %v220_v22  ;;  %v232_v36 = vrot.slane %v1963_v3, 6 }
 0x1eb   :  { %v218_v37 = vsel %vm202_vm9, %v217_v26, %v216_v31  ;;  %v229_v38 = vsel %vm196_vm7, %v1950_v49, %v228_v28  ;;  %v235_v39 = vrot.slane %v1946_v47, 6  ;;  %v236_v40 = vrot.slane %v1950_v49, 5 }
 0x1ec   :  { %v263_v41 = vsel %vm261_vm10, %v210_v21, %v218_v37  ;;  %v224_v42 = vsel %vm95_vm3, %v223_v24, %v222_v35  ;;  %v231_v43 = vsel %vm199_vm8, %v230_v30, %v229_v38  ;;  %v238_v44 = vrot.slane %v1954_v51, 4 }
 0x1ed   :  { %v266_v45 = vpack.c.bf16 %v263_v41, %v262_v32  ;;  %1648 = vmatpush3.bf16.msra.mxu1 %v2039_v27  ;;  %v225_v46 = vrot.slane %v1963_v3, 1  ;;  %v237_v48 = vsel %vm93_vm2, %v236_v40, %v235_v39  ;;  %v240_v50 = vrot.slane %v1963_v3, 3 }
 0x1ee   :  { %v239_v52 = vsel %vm95_vm3, %v238_v44, %v237_v48  ;;  %v243_v8 = vrot.slane %v1946_v47, 3  ;;  %v244_v4 = vrot.slane %v1950_v49, 2  ;;  %v246_v5 = vrot.slane %v1954_v51, 1  ;;  %1653 = vmatprep.subr.bf16.mxu1 %v1814_v29 }
 0x1ef   :  { %1634 = vmatmul.mubr.msk.bf16.vlgmr.msra.gmra.mrb[0].mxu0 %vm51_vm0, %v266_v45  ;;  %v226_v6 = vsel %vm97_vm4, %v225_v46, %v224_v42  ;;  %v233_v13 = vsel %vm202_vm9, %v232_v36, %v231_v43  ;;  %v241_v14 = vsel %vm97_vm4, %v240_v50, %v239_v52 }
 0x1f0   :  { %1637 = vmatprep.mubr.msk.bf16.mxu0 %vm1815_vm6, %v1814_v29  ;;  %1650 = vmatmul.mubr.bf16.vlgmr.msra.gmra.mrb[4].mxu1 %v1813_v0  ;;  %v245_v47 = vsel %vm196_vm7, %v244_v4, %v243_v8  ;;  %v264_v15 = vsel %vm261_vm10, %v226_v6, %v233_v13 }
 0x1f1   :  { %v247_v49 = vsel %vm199_vm8, %v246_v5, %v245_v47  ;;  %1654 = vmatpush3.bf16.msra.mxu1 %v2015_v1  ;;  %1657 = vmatprep.mubr.msk.bf16.mxu1 %vm1815_vm6, %v1814_v29 }
 0x1f2   :  { %v248_v51 = vsel %vm202_vm9, %v1963_v3, %v247_v49  ;;  %1655 = vmatprep.subr.bf16.mxu1 %v1814_v29  ;;  %1670 = vmatpush3.bf16.msra.mxu0 %v2015_v1  ;;  %v1576_v3 = vld [vmem:[%s2533_s4] ss:$0 sm:$0xff]  ;;  %s1816_s4 = smov 64  }
 0x1f3   :  { %v265_v0 = vsel %vm261_vm10, %v241_v14, %v248_v51  ;;  %1671 = vmatprep.subr.bf16.mxu0 %v1814_v29 }
 0x1f4   :  { %v267_v53 = vpack.c.bf16 %v265_v0, %v264_v15 }
 0x1f5   :  { %1656 = vmatpush3.bf16.msra.mxu1 %v2039_v27 }
 0x1f6   :  { %1661 = vmatprep.subr.bf16.mxu1 %v1814_v29  ;;  %1672 = vmatpush3.bf16.msra.mxu0 %v2039_v27 }
 0x1f7   :  { %1638 = vmatmul.mubr.msk.bf16.gmra.mrb[4].mxu0 %vm51_vm0, %v267_v53  ;;  %1685 = vmatprep.subr.bf16.mxu0 %v1814_v29 }
 0x1f8   :  { %1673 = vmatprep.mubr.msk.bf16.mxu0 %vm1815_vm6, %v1814_v29 }
 0x2bb   :  { %v343_v54 = vpop.f32.mrb[0].mxu1 }
 0x2bc   :  { %v2097_v55 = vadd.f32 %v1576_v3, %v343_v54  ;;  %v1643_v56 = vpop.f32.mrb[1].mxu1 }
 0x2bd   :  { %v346_v57 = vpop.f32.mrb[2].mxu1 }
 0x2be   :  { %v1644_v58 = vpop.f32.mrb[3].mxu1 }
 0x2c2   :  { %v327_v59 = vpop.f32.mrb[0].mxu0 }
 0x2c3   :  { %v328_v60 = vadd.f32 %v1576_v3, %v327_v59  ;;  %v1635_v61 = vpop.f32.mrb[1].mxu0  ;;  %v403_v62 = vpop.f32.mrb[4].mxu1 }
 0x2c4   :  { %v330_v63 = vpop.f32.mrb[2].mxu0  ;;  %v1651_v2 = vpop.f32.mrb[5].mxu1 }
 0x2c5   :  { %v2099_v7 = vadd.f32 %v1576_v3, %v330_v63  ;;  %v1636_v9 = vpop.f32.mrb[3].mxu0  ;;  %v409_v10 = vadd.f32 %v403_v62, %v328_v60  ;;  %v406_v11 = vpop.f32.mrb[6].mxu1 }
 0x2c6   :  { %v1652_v12 = vpop.f32.mrb[7].mxu1 }
 0x2c7   :  { %1741 = vtanh.f32 %v409_v10  ;;  %v1583_v23 = vmul.f32 -1.442695, %v409_v10 }
 0x2c9   :  { %1743 = vpow2.f32 %v1583_v23 }
 0x2ca   :  { %v335_v16 = vpop.f32.mrb[4].mxu0 }
 0x2cb   :  { %v2101_v17 = vadd.f32 %v1576_v3, %v335_v16  ;;  %v1639_v18 = vpop.f32.mrb[5].mxu0 }
 0x2cc   :  { %v338_v19 = vpop.f32.mrb[6].mxu0 }
 0x2cd   :  { %v2103_v20 = vadd.f32 %v1576_v3, %v338_v19  ;;  %v1640_v21 = vpop.f32.mrb[7].mxu0 }
 0x2d1   :  { %v1742_v22 = vpop.eup %1741 }
 0x2d2   :  { %419 = vrot.lane.b32.xlu0 %v1742_v22, %s1816_s4 }
 0x2d3   :  { %v1744_v24 = vpop.eup %1743 }
 0x2d4   :  { %v413_v25 = vadd.f32 1.0, %v1744_v24 }
 0x2d6   :  { %1745 = vrcp.f32 %v413_v25 }
 0x2e0   :  { %v1746_v26 = vpop.eup %1745 }
 0x2e1   :  { %v417_v31 = vmul.f32 0.0, %v1746_v26 }
 0x344   :  { %v420_v28 = vpop.permute.xlu0 %419 }
 0x345   :  { %v422_v30 = vmul.f32 %v1746_v26, %v420_v28 }
 0x347   :  { %424 = vrot.lane.b32.xlu1 %v422_v30, %s1817_s11 }
 0x3b9   :  { %v425_v32 = vpop.permute.xlu1 %424 }
 0x3ba   :  { %v427_v35 = vadd.f32 %v425_v32, %v417_v31 }
 0x3bc   :  { %1747 = vtanh.f32 %v427_v35  ;;  %v551_v13 = vrot.slane %v427_v35, 4 }
 0x3c6   :  { %v1748_v36 = vpop.eup %1747 }
 0x3c7   :  { %430 = vrot.lane.b32.xlu0 %v1748_v36, %s1816_s4 }
 0x439   :  { %v431_v37 = vpop.permute.xlu0 %430 }
 0x43a   :  { %v2108_v38 = vmul.f32 %v1746_v26, %v431_v37 }
 0x43c   :  { %v492_v39 = vpack.c.bf16 %v2108_v38, %v2108_v38 }
 0x43e   :  { %494 = vrot.lane.b32.xlu0 %v492_v39, %s1817_s11 }
 0x4b0   :  { %v495_v40 = vpop.permute.xlu0 %494 }
 0x4b1   :  { %1658 = vmatmul.mubr.msk.bf16.vlgmr.msra.gmra.mrb[8].mxu1 %vm365_vm11, %v495_v40 }
 0x4b2   :  { %1662 = vmatpush3.bf16.msra.mxu1 %v2015_v1  ;;  %1665 = vmatprep.mubr.msk.bf16.mxu1 %vm1815_vm6, %v1814_v29 }
 0x4b3   :  { %1663 = vmatprep.subr.bf16.mxu1 %v1814_v29 }
 0x4b6   :  { %1664 = vmatpush3.bf16.msra.mxu1 %v2039_v27 }
 0x4b7   :  { %1677 = vmatprep.subr.bf16.mxu1 %v1814_v29 }
 0x584   :  { %v533_v41 = vpop.f32.mrb[8].mxu1 }
 0x585   :  { %v540_v42 = vrot.slane %v533_v41, 4  ;;  %v1659_v43 = vpop.f32.mrb[9].mxu1 }
 0x586   :  { %v536_v44 = vpop.f32.mrb[10].mxu1 }
 0x587   :  { %v542_v45 = vadd.f32 %v540_v42, %v328_v60  ;;  %v1660_v46 = vpop.f32.mrb[11].mxu1 }
 0x589   :  { %1749 = vtanh.f32 %v542_v45  ;;  %v1585_v50 = vmul.f32 -1.442695, %v542_v45 }
 0x58b   :  { %1751 = vpow2.f32 %v1585_v50 }
 0x593   :  { %v1750_v48 = vpop.eup %1749 }
 0x594   :  { %555 = vrot.lane.b32.xlu0 %v1750_v48, %s1816_s4 }
 0x595   :  { %v1752_v52 = vpop.eup %1751 }
 0x596   :  { %v546_v8 = vadd.f32 1.0, %v1752_v52 }
 0x598   :  { %1753 = vrcp.f32 %v546_v8 }
 0x5a2   :  { %v1754_v4 = vpop.eup %1753 }
 0x5a3   :  { %v553_v14 = vmul.f32 %v1754_v4, %v551_v13 }
 0x606   :  { %v556_v5 = vpop.permute.xlu0 %555 }
 0x607   :  { %v558_v6 = vmul.f32 %v1754_v4, %v556_v5 }
 0x609   :  { %560 = vrot.lane.b32.xlu0 %v558_v6, %s1817_s11 }
 0x67b   :  { %v561_v47 = vpop.permute.xlu0 %560 }
 0x67c   :  { %v563_v49 = vadd.f32 %v561_v47, %v553_v14 }
 0x67e   :  { %1755 = vtanh.f32 %v563_v49  ;;  %v685_v12 = vrot.slane %v563_v49, 4 }
 0x688   :  { %v1756_v51 = vpop.eup %1755 }
 0x689   :  { %566 = vrot.lane.b32.xlu1 %v1756_v51, %s1816_s4 }
 0x6fb   :  { %v567_v15 = vpop.permute.xlu1 %566 }
 0x6fc   :  { %v2123_v0 = vmul.f32 %v1754_v4, %v567_v15 }
 0x6fe   :  { %v628_v53 = vpack.c.bf16 %v2123_v0, %v2123_v0 }
 0x700   :  { %v630_v3 = vrot.slane %v628_v53, 2 }
 0x702   :  { %631 = vrot.lane.b32.xlu0 %v630_v3, %s1817_s11 }
 0x774   :  { %v632_v54 = vpop.permute.xlu0 %631 }
 0x775   :  { %1666 = vmatmul.mubr.msk.bf16.vlgmr.msra.gmra.mrb[12].mxu1 %vm365_vm11, %v632_v54 }
 0x776   :  { %1678 = vmatpush3.bf16.msra.mxu1 %v2015_v1  ;;  %1681 = vmatprep.mubr.msk.bf16.mxu1 %vm1815_vm6, %v1814_v29 }
 0x777   :  { %1679 = vmatprep.subr.bf16.mxu1 %v1814_v29 }
 0x77a   :  { %1680 = vmatpush3.bf16.msra.mxu1 %v2039_v27 }
 0x77b   :  { %1693 = vmatprep.subr.bf16.mxu1 %v1814_v29 }
 0x848   :  { %v670_v56 = vpop.f32.mrb[12].mxu1 }
 0x849   :  { %v676_v57 = vadd.f32 %v670_v56, %v2099_v7  ;;  %v1667_v58 = vpop.f32.mrb[13].mxu1 }
 0x84a   :  { %v673_v59 = vpop.f32.mrb[14].mxu1 }
 0x84b   :  { %1757 = vtanh.f32 %v676_v57  ;;  %v1668_v60 = vpop.f32.mrb[15].mxu1  ;;  %v1587_v62 = vmul.f32 -1.442695, %v676_v57 }
 0x84d   :  { %1759 = vpow2.f32 %v1587_v62 }
 0x855   :  { %v1758_v61 = vpop.eup %1757 }
 0x856   :  { %689 = vrot.lane.b32.xlu1 %v1758_v61, %s1816_s4 }
 0x857   :  { %v1760_v63 = vpop.eup %1759 }
 0x858   :  { %v680_v2 = vadd.f32 1.0, %v1760_v63 }
 0x85a   :  { %1761 = vrcp.f32 %v680_v2 }
 0x864   :  { %v1762_v9 = vpop.eup %1761 }
 0x865   :  { %v687_v16 = vmul.f32 %v1762_v9, %v685_v12 }
 0x8c8   :  { %v690_v10 = vpop.permute.xlu1 %689 }
 0x8c9   :  { %v692_v11 = vmul.f32 %v1762_v9, %v690_v10 }
 0x8cb   :  { %694 = vrot.lane.b32.xlu0 %v692_v11, %s1817_s11 }
 0x93d   :  { %v695_v18 = vpop.permute.xlu0 %694 }
 0x93e   :  { %v697_v19 = vadd.f32 %v695_v18, %v687_v16 }
 0x940   :  { %1763 = vtanh.f32 %v697_v19  ;;  %v820_v44 = vrot.slane %v697_v19, 4 }
 0x94a   :  { %v1764_v21 = vpop.eup %1763 }
 0x94b   :  { %700 = vrot.lane.b32.xlu1 %v1764_v21, %s1816_s4 }
 0x9bd   :  { %v701_v22 = vpop.permute.xlu1 %700 }
 0x9be   :  { %v2139_v23 = vmul.f32 %v1762_v9, %v701_v22 }
 0x9c0   :  { %v761_v24 = vpack.c.bf16 %v2139_v23, %v2139_v23 }
 0x9c2   :  { %763 = vrot.lane.b32.xlu0 %v761_v24, %s1817_s11 }
 0xa34   :  { %v764_v25 = vpop.permute.xlu0 %763 }
 0xa35   :  { %1674 = vmatmul.mubr.msk.bf16.vlgmr.msra.gmra.mrb[8].mxu0 %vm365_vm11, %v764_v25 }
 0xa36   :  { %1686 = vmatpush3.bf16.msra.mxu0 %v2015_v1  ;;  %1689 = vmatprep.mubr.msk.bf16.mxu0 %vm1815_vm6, %v1814_v29 }
 0xa37   :  { %1687 = vmatprep.subr.bf16.mxu0 %v1814_v29 }
 0xa3a   :  { %1688 = vmatpush3.bf16.msra.mxu0 %v2039_v27 }
 0xa3b   :  { %1701 = vmatprep.subr.bf16.mxu0 %v1814_v29 }
 0xb08   :  { %v802_v26 = vpop.f32.mrb[8].mxu0 }
 0xb09   :  { %v809_v28 = vrot.slane %v802_v26, 4  ;;  %v1675_v30 = vpop.f32.mrb[9].mxu0 }
 0xb0a   :  { %v805_v31 = vpop.f32.mrb[10].mxu0 }
 0xb0b   :  { %v811_v32 = vadd.f32 %v809_v28, %v2099_v7  ;;  %v1676_v35 = vpop.f32.mrb[11].mxu0 }
 0xb0d   :  { %1765 = vtanh.f32 %v811_v32  ;;  %v1589_v37 = vmul.f32 -1.442695, %v811_v32 }
 0xb0f   :  { %1767 = vpow2.f32 %v1589_v37 }
 0xb17   :  { %v1766_v36 = vpop.eup %1765 }
 0xb18   :  { %824 = vrot.lane.b32.xlu1 %v1766_v36, %s1816_s4 }
 0xb19   :  { %v1768_v39 = vpop.eup %1767 }
 0xb1a   :  { %v815_v40 = vadd.f32 1.0, %v1768_v39 }
 0xb1c   :  { %1769 = vrcp.f32 %v815_v40 }
 0xb26   :  { %v1770_v41 = vpop.eup %1769 }
 0xb27   :  { %v822_v45 = vmul.f32 %v1770_v41, %v820_v44 }
 0xb8a   :  { %v825_v42 = vpop.permute.xlu1 %824 }
 0xb8b   :  { %v827_v43 = vmul.f32 %v1770_v41, %v825_v42 }
 0xb8d   :  { %829 = vrot.lane.b32.xlu0 %v827_v43, %s1817_s11 }
 0xbff   :  { %v830_v46 = vpop.permute.xlu0 %829 }
 0xc00   :  { %v832_v48 = vadd.f32 %v830_v46, %v822_v45 }
 0xc02   :  { %1771 = vtanh.f32 %v832_v48  ;;  %v954_v58 = vrot.slane %v832_v48, 4 }
 0xc0c   :  { %v1772_v7 = vpop.eup %1771 }
 0xc0d   :  { %835 = vrot.lane.b32.xlu1 %v1772_v7, %s1816_s4 }
 0xc7f   :  { %v836_v50 = vpop.permute.xlu1 %835 }
 0xc80   :  { %v2155_v52 = vmul.f32 %v1770_v41, %v836_v50 }
 0xc82   :  { %v897_v8 = vpack.c.bf16 %v2155_v52, %v2155_v52 }
 0xc84   :  { %v899_v4 = vrot.slane %v897_v8, 2 }
 0xc86   :  { %900 = vrot.lane.b32.xlu0 %v899_v4, %s1817_s11 }
 0xcf8   :  { %v901_v5 = vpop.permute.xlu0 %900 }
 0xcf9   :  { %1682 = vmatmul.mubr.msk.bf16.vlgmr.msra.gmra.mrb[16].mxu1 %vm365_vm11, %v901_v5 }
 0xcfa   :  { %1694 = vmatpush3.bf16.msra.mxu1 %v2015_v1  ;;  %1697 = vmatprep.mubr.msk.bf16.mxu1 %vm1815_vm6, %v1814_v29 }
 0xcfb   :  { %1695 = vmatprep.subr.bf16.mxu1 %v1814_v29 }
 0xcfe   :  { %1696 = vmatpush3.bf16.msra.mxu1 %v2039_v27 }
 0xdcc   :  { %v939_v6 = vpop.f32.mrb[16].mxu1 }
 0xdcd   :  { %v945_v13 = vadd.f32 %v939_v6, %v2101_v17  ;;  %v1683_v14 = vpop.f32.mrb[17].mxu1 }
 0xdce   :  { %v942_v47 = vpop.f32.mrb[18].mxu1 }
 0xdcf   :  { %1773 = vtanh.f32 %v945_v13  ;;  %v1684_v49 = vpop.f32.mrb[19].mxu1  ;;  %v1591_v15 = vmul.f32 -1.442695, %v945_v13 }
 0xdd1   :  { %1775 = vpow2.f32 %v1591_v15 }
 0xdd9   :  { %v1774_v51 = vpop.eup %1773 }
 0xdda   :  { %958 = vrot.lane.b32.xlu1 %v1774_v51, %s1816_s4 }
 0xddb   :  { %v1776_v53 = vpop.eup %1775 }
 0xddc   :  { %v949_v3 = vadd.f32 1.0, %v1776_v53 }
 0xdde   :  { %1777 = vrcp.f32 %v949_v3 }
 0xde8   :  { %v1778_v54 = vpop.eup %1777 }
 0xde9   :  { %v956_v59 = vmul.f32 %v1778_v54, %v954_v58 }
 0xe4c   :  { %v959_v56 = vpop.permute.xlu1 %958 }
 0xe4d   :  { %v961_v57 = vmul.f32 %v1778_v54, %v959_v56 }
 0xe4f   :  { %963 = vrot.lane.b32.xlu0 %v961_v57, %s1817_s11 }
 0xec1   :  { %v964_v60 = vpop.permute.xlu0 %963 }
 0xec2   :  { %v966_v61 = vadd.f32 %v964_v60, %v956_v59 }
 0xec4   :  { %1779 = vtanh.f32 %v966_v61  ;;  %v1089_v32 = vrot.slane %v966_v61, 4 }
 0xece   :  { %v1780_v62 = vpop.eup %1779 }
 0xecf   :  { %969 = vrot.lane.b32.xlu1 %v1780_v62, %s1816_s4 }
 0xf41   :  { %v970_v63 = vpop.permute.xlu1 %969 }
 0xf42   :  { %v2170_v2 = vmul.f32 %v1778_v54, %v970_v63 }
 0xf44   :  { %v1030_v9 = vpack.c.bf16 %v2170_v2, %v2170_v2 }
 0xf46   :  { %1032 = vrot.lane.b32.xlu0 %v1030_v9, %s1817_s11 }
 0xfb8   :  { %v1033_v10 = vpop.permute.xlu0 %1032 }
 0xfb9   :  { %1690 = vmatmul.mubr.msk.bf16.vlgmr.msra.gmra.mrb[12].mxu0 %vm365_vm11, %v1033_v10 }
 0xfba   :  { %1702 = vmatpush3.bf16.msra.mxu0 %v2015_v1  ;;  %1705 = vmatprep.mubr.msk.bf16.mxu0 %vm1815_vm6, %v1814_v29 }
 0xfbb   :  { %1703 = vmatprep.subr.bf16.mxu0 %v1814_v29 }
 0xfbe   :  { %1704 = vmatpush3.bf16.msra.mxu0 %v2039_v27 }
 0xfbf   :  { %1709 = vmatprep.subr.bf16.mxu0 %v1814_v29 }
0x108c   :  { %v1071_v11 = vpop.f32.mrb[12].mxu0 }
0x108d   :  { %v1078_v12 = vrot.slane %v1071_v11, 4  ;;  %v1691_v16 = vpop.f32.mrb[13].mxu0 }
0x108e   :  { %v1074_v18 = vpop.f32.mrb[14].mxu0 }
0x108f   :  { %v1080_v19 = vadd.f32 %v1078_v12, %v2101_v17  ;;  %v1692_v21 = vpop.f32.mrb[15].mxu0 }
0x1091   :  { %1781 = vtanh.f32 %v1080_v19  ;;  %v1593_v24 = vmul.f32 -1.442695, %v1080_v19 }
0x1093   :  { %1783 = vpow2.f32 %v1593_v24 }
0x109b   :  { %v1782_v22 = vpop.eup %1781 }
0x109c   :  { %1093 = vrot.lane.b32.xlu1 %v1782_v22, %s1816_s4 }
0x109d   :  { %v1784_v25 = vpop.eup %1783 }
0x109e   :  { %v1084_v26 = vadd.f32 1.0, %v1784_v25 }
0x10a0   :  { %1785 = vrcp.f32 %v1084_v26 }
0x10aa   :  { %v1786_v28 = vpop.eup %1785 }
0x10ab   :  { %v1091_v35 = vmul.f32 %v1786_v28, %v1089_v32 }
0x110e   :  { %v1094_v30 = vpop.permute.xlu1 %1093 }
0x110f   :  { %v1096_v31 = vmul.f32 %v1786_v28, %v1094_v30 }
0x1111   :  { %1098 = vrot.lane.b32.xlu0 %v1096_v31, %s1817_s11 }
0x1183   :  { %v1099_v36 = vpop.permute.xlu0 %1098 }
0x1184   :  { %v1101_v37 = vadd.f32 %v1099_v36, %v1091_v35 }
0x1186   :  { %1787 = vtanh.f32 %v1101_v37  ;;  %v1223_v47 = vrot.slane %v1101_v37, 4 }
0x1190   :  { %v1788_v17 = vpop.eup %1787 }
0x1191   :  { %1104 = vrot.lane.b32.xlu1 %v1788_v17, %s1816_s4 }
0x1203   :  { %v1105_v39 = vpop.permute.xlu1 %1104 }
0x1204   :  { %v2186_v40 = vmul.f32 %v1786_v28, %v1105_v39 }
0x1206   :  { %v1166_v41 = vpack.c.bf16 %v2186_v40, %v2186_v40 }
0x1208   :  { %v1168_v42 = vrot.slane %v1166_v41, 2  ;;  %v1818_v41 = vmov 1966171168  }
0x120a   :  { %1169 = vrot.lane.b32.xlu0 %v1168_v42, %s1817_s11  ;;  %v436_v42 = vunpack.c.l.s4 %v1818_v41 }
0x127c   :  { %v1170_v43 = vpop.permute.xlu0 %1169 }
0x127d   :  { %1698 = vmatmul.mubr.msk.bf16.vlgmr.msra.gmra.mrb[20].mxu1 %vm365_vm11, %v1170_v43 }
0x1350   :  { %v1208_v44 = vpop.f32.mrb[20].mxu1 }
0x1351   :  { %v1214_v45 = vadd.f32 %v1208_v44, %v2103_v20  ;;  %v1699_v46 = vpop.f32.mrb[21].mxu1  ;;  %v437_v44 = vunpack.c.0.s8 %v436_v42 }
0x1352   :  { %v1211_v48 = vpop.f32.mrb[22].mxu1 }
0x1353   :  { %1789 = vtanh.f32 %v1214_v45  ;;  %v1700_v7 = vpop.f32.mrb[23].mxu1  ;;  %v1595_v8 = vmul.f32 -1.442695, %v1214_v45  ;;  %v2223_v45 = vsub.s32 %v437_v44, %v1936_v33 }
0x1355   :  { %1791 = vpow2.f32 %v1595_v8 }
0x135d   :  { %v1790_v50 = vpop.eup %1789 }
0x135e   :  { %1227 = vrot.lane.b32.xlu1 %v1790_v50, %s1816_s4  ;;  %v571_v50 = vcombine.high %v2123_v0, %v2123_v0  ;;  %v2248_v0 = vrot.slane %v2139_v23, %v2223_v45 }
0x135f   :  { %v1792_v4 = vpop.eup %1791 }
0x1360   :  { %v1218_v5 = vadd.f32 1.0, %v1792_v4  ;;  %v2238_v33 = vrot.slane %v571_v50, %v2223_v45 }
0x1362   :  { %1793 = vrcp.f32 %v1218_v5 }
0x136c   :  { %v1794_v6 = vpop.eup %1793 }
0x136d   :  { %v1225_v49 = vmul.f32 %v1794_v6, %v1223_v47  ;;  %v719_v47 = vrot.slane %v2248_v0, %v2223_v45 }
0x136f   :  { %v732_v23 = vrot.slane %v719_v47, %v1939_v34 }
0x13d0   :  { %v1228_v13 = vpop.permute.xlu1 %1227 }
0x13d1   :  { %v1230_v14 = vmul.f32 %v1794_v6, %v1228_v13 }
0x13d3   :  { %1232 = vrot.lane.b32.xlu0 %v1230_v14, %s1817_s11 }
0x1445   :  { %v1233_v51 = vpop.permute.xlu0 %1232 }
0x1446   :  { %v1235_v15 = vadd.f32 %v1233_v51, %v1225_v49  ;;  %v840_v49 = vcombine.high %v2155_v52, %v2155_v52  ;;  %v2269_v52 = vrot.slane %v2170_v2, %v2223_v45 }
0x1448   :  { %1795 = vtanh.f32 %v1235_v15 }
0x1452   :  { %v1796_v53 = vpop.eup %1795 }
0x1453   :  { %1238 = vrot.lane.b32.xlu1 %v1796_v53, %s1816_s4  ;;  %v727_v53 = vcombine.high %v719_v47, %v719_v47 }
0x14c5   :  { %v1239_v3 = vpop.permute.xlu1 %1238 }
0x14c6   :  { %v2196_v54 = vmul.f32 %v1794_v6, %v1239_v3  ;;  %v586_v6 = vrot.slane %v2238_v33, %v2223_v45  ;;  %v740_v3 = vrot.slane %v727_v53, %v1939_v34 }
0x14c8   :  { %v1299_v56 = vpack.c.bf16 %v2196_v54, %v2196_v54  ;;  %v599_v13 = vrot.slane %v586_v6, %v1939_v34  ;;  %v594_v14 = vcombine.high %v586_v6, %v586_v6 }
0x14ca   :  { %1301 = vrot.lane.b32.xlu0 %v1299_v56, %s1817_s11  ;;  %v607_v51 = vrot.slane %v594_v14, %v1939_v34 }
0x153c   :  { %v1302_v57 = vpop.permute.xlu0 %1301 }
0x153d   :  { %1706 = vmatmul.mubr.msk.bf16.vlgmr.msra.gmra.mrb[16].mxu0 %vm365_vm11, %v1302_v57 }
0x153e   :  { %1710 = vmatpush3.bf16.msra.mxu0 %v2015_v1  ;;  %1713 = vmatprep.mubr.msk.bf16.mxu0 %vm1815_vm6, %v1814_v29 }
0x153f   :  { %1711 = vmatprep.subr.bf16.mxu0 %v1814_v29 }
0x1542   :  { %1712 = vmatpush3.bf16.msra.mxu0 %v2039_v27  ;;  %v1358_v27 = vrot.slane %v1235_v15, 4  ;;  %v2259_v15 = vrot.slane %v840_v49, %v2223_v45 }
0x1544   :  { %v855_v56 = vrot.slane %v2259_v15, %v2223_v45  ;;  %v848_v6 = vcombine.high %v2259_v15, %v2259_v15  ;;  %v981_v15 = vcombine.high %v2269_v52, %v2269_v52 }
0x1546   :  { %v868_v57 = vrot.slane %v855_v56, %v1939_v34 }
0x1610   :  { %v1340_v58 = vpop.f32.mrb[16].mxu0 }
0x1611   :  { %v1347_v59 = vrot.slane %v1340_v58, 4  ;;  %v1707_v60 = vpop.f32.mrb[17].mxu0  ;;  %v863_v58 = vcombine.high %v855_v56, %v855_v56 }
0x1612   :  { %v1343_v61 = vpop.f32.mrb[18].mxu0  ;;  %v1109_v60 = vcombine.high %v2186_v40, %v2186_v40  ;;  %v2290_v40 = vrot.slane %v2196_v54, %v2223_v45 }
0x1613   :  { %v1349_v62 = vadd.f32 %v1347_v59, %v2103_v20  ;;  %v1708_v63 = vpop.f32.mrb[19].mxu0  ;;  %v988_v59 = vrot.slane %v2269_v52, %v2223_v45  ;;  %v876_v61 = vrot.slane %v863_v58, %v1939_v34  ;;  %v995_v58 = vrot.slane %v981_v15, %v2223_v45 }
0x1615   :  { %1797 = vtanh.f32 %v1349_v62  ;;  %v1597_v10 = vmul.f32 -1.442695, %v1349_v62  ;;  %v2280_v62 = vrot.slane %v1109_v60, %v2223_v45  ;;  %v1001_v2 = vrot.slane %v988_v59, %v1939_v34 }
0x1616   :  { %v996_v63 = vcombine.high %v988_v59, %v988_v59  ;;  %v1005_v60 = vrot.slane %v995_v58, %v1939_v34 }
0x1617   :  { %1799 = vpow2.f32 %v1597_v10  ;;  %v1124_v10 = vrot.slane %v2280_v62, %v2223_v45  ;;  %v1117_v52 = vcombine.high %v2280_v62, %v2280_v62  ;;  %v1250_v62 = vcombine.high %v2290_v40, %v2290_v40 }
0x161f   :  { %v1798_v9 = vpop.eup %1797 }
0x1620   :  { %1362 = vrot.lane.b32.xlu1 %v1798_v9, %s1816_s4  ;;  %v1009_v9 = vrot.slane %v996_v63, %v1939_v34 }
0x1621   :  { %v1800_v1 = vpop.eup %1799 }
0x1622   :  { %v1353_v11 = vadd.f32 1.0, %v1800_v1  ;;  %v1137_v1 = vrot.slane %v1124_v10, %v1939_v34 }
0x1624   :  { %1801 = vrcp.f32 %v1353_v11  ;;  %v1132_v11 = vcombine.high %v1124_v10, %v1124_v10 }
0x162e   :  { %v1802_v12 = vpop.eup %1801 }
0x162f   :  { %v1360_v18 = vmul.f32 %v1802_v12, %v1358_v27 }
0x1692   :  { %v1363_v29 = vpop.permute.xlu1 %1362 }
0x1693   :  { %v1365_v16 = vmul.f32 %v1802_v12, %v1363_v29 }
0x1695   :  { %1367 = vrot.lane.b32.xlu0 %v1365_v16, %s1817_s11  ;;  %v1145_v16 = vrot.slane %v1132_v11, %v1939_v34 }
0x1707   :  { %v1368_v19 = vpop.permute.xlu0 %1367 }
0x1708   :  { %v2210_v21 = vadd.f32 %v1368_v19, %v1360_v18 }
0x170a   :  { %1803 = vtanh.f32 %v2210_v21 }
0x1714   :  { %v1804_v20 = vpop.eup %1803 }
0x1715   :  { %1373 = vrot.lane.b32.xlu1 %v1804_v20, %s1816_s4 }
0x1787   :  { %v1374_v22 = vpop.permute.xlu1 %1373 }
0x1788   :  { %v2214_v24 = vmul.f32 %v1802_v12, %v1374_v22  ;;  %v1257_v12 = vrot.slane %v2290_v40, %v2223_v45 }
0x178a   :  { %v1435_v25 = vpack.c.bf16 %v2214_v24, %v2214_v24  ;;  %v1378_v29 = vcombine.high %v2214_v24, %v2214_v24  ;;  %v1270_v54 = vrot.slane %v1257_v12, %v1939_v34  ;;  %v1265_v18 = vcombine.high %v1257_v12, %v1257_v12 }
0x178c   :  { %v1437_v26 = vrot.slane %v1435_v25, 2  ;;  %v2301_v27 = vrot.slane %v1378_v29, %v2223_v45  ;;  %v1278_v19 = vrot.slane %v1265_v18, %v1939_v34 }
0x178e   :  { %1438 = vrot.lane.b32.xlu0 %v1437_v26, %s1817_s11  ;;  %v1393_v20 = vrot.slane %v2301_v27, %v2223_v45  ;;  %v1492_v26 = vrot.slane %v2210_v21, 4  ;;  %v1386_v40 = vcombine.high %v2301_v27, %v2301_v27 }
0x1790   :  { %v1406_v22 = vrot.slane %v1393_v20, %v1939_v34  ;;  %v1401_v24 = vcombine.high %v1393_v20, %v1393_v20 }
0x1792   :  { %v1414_v25 = vrot.slane %v1401_v24, %v1939_v34 }
0x1800   :  { %v1439_v28 = vpop.permute.xlu0 %1438 }
0x1801   :  { %1714 = vmatmul.mubr.msk.bf16.vlgmr.msra.gmra.mrb[20].mxu0 %vm365_vm11, %v1439_v28 }
0x18d4   :  { %v1477_v30 = vpop.f32.mrb[20].mxu0 }
0x18d5   :  { %v1483_v31 = vadd.f32 %v1477_v30, %v2097_v55  ;;  %v1715_v32 = vpop.f32.mrb[21].mxu0  ;;  %v2227_v55 = vrot.slane %v2108_v38, %v2223_v45 }
0x18d6   :  { %v1480_v35 = vpop.f32.mrb[22].mxu0 }
0x18d7   :  { %1805 = vtanh.f32 %v1483_v31  ;;  %v1716_v36 = vpop.f32.mrb[23].mxu0  ;;  %v1599_v17 = vmul.f32 -1.442695, %v1483_v31  ;;  %v449_v7 = vrot.slane %v2227_v55, %v2223_v45  ;;  %v442_v35 = vcombine.high %v2227_v55, %v2227_v55 }
0x18d9   :  { %1807 = vpow2.f32 %v1599_v17  ;;  %v462_v4 = vrot.slane %v449_v7, %v1939_v34  ;;  %v457_v38 = vcombine.high %v449_v7, %v449_v7  ;;  %v712_v7 = vcombine.high %v2248_v0, %v2248_v0 }
0x18db   :  { %v470_v5 = vrot.slane %v457_v38, %v1939_v34 }
0x18e1   :  { %v1806_v37 = vpop.eup %1805 }
0x18e2   :  { %1496 = vrot.lane.b32.xlu1 %v1806_v37, %s1816_s4  ;;  %v456_v37 = vrot.slane %v442_v35, %v2223_v45 }
0x18e3   :  { %v1808_v39 = vpop.eup %1807 }
0x18e4   :  { %v1487_v43 = vadd.f32 1.0, %v1808_v39  ;;  %v579_v39 = vcombine.high %v2238_v33, %v2238_v33  ;;  %v466_v42 = vrot.slane %v456_v37, %v1939_v34 }
0x18e6   :  { %1809 = vrcp.f32 %v1487_v43  ;;  %v458_v43 = vcombine.high %v456_v37, %v456_v37 }
0x18e8   :  { %v474_v55 = vrot.slane %v458_v43, %v1939_v34 }
0x18f0   :  { %v2229_v46 = vpop.eup %1809 }
0x18f1   :  { %v1494_v28 = vmul.f32 %v2229_v46, %v1492_v26 }
0x1954   :  { %v1497_v48 = vpop.permute.xlu1 %1496 }
0x1955   :  { %v1499_v8 = vmul.f32 %v2229_v46, %v1497_v48  ;;  %v593_v48 = vrot.slane %v579_v39, %v2223_v45 }
0x1957   :  { %1501 = vrot.lane.b32.xlu0 %v1499_v8, %s1817_s11  ;;  %v603_v8 = vrot.slane %v593_v48, %v1939_v34  ;;  %v595_v33 = vcombine.high %v593_v48, %v593_v48 }
0x1959   :  { %v611_v38 = vrot.slane %v595_v33, %v1939_v34 }
0x195b   :  { %475 = vrot.lane.b32.xlu0 %v462_v4, %s1817_s11 }
0x195f   :  { %479 = vrot.lane.b32.xlu0 %v470_v5, %s1817_s11  ;;  %v726_v5 = vrot.slane %v712_v7, %v2223_v45 }
0x1961   :  { %v728_v14 = vcombine.high %v726_v5, %v726_v5 }
0x1963   :  { %612 = vrot.lane.b32.xlu0 %v599_v13, %s1817_s11  ;;  %v736_v13 = vrot.slane %v726_v5, %v1939_v34  ;;  %v744_v49 = vrot.slane %v728_v14, %v1939_v34 }
0x1967   :  { %616 = vrot.lane.b32.xlu0 %v607_v51, %s1817_s11  ;;  %v862_v51 = vrot.slane %v848_v6, %v2223_v45 }
0x1969   :  { %v872_v53 = vrot.slane %v862_v51, %v1939_v34 }
0x196b   :  { %745 = vrot.lane.b32.xlu0 %v732_v23, %s1817_s11 }
0x196f   :  { %749 = vrot.lane.b32.xlu0 %v740_v3, %s1817_s11  ;;  %v864_v3 = vcombine.high %v862_v51, %v862_v51 }
0x1973   :  { %881 = vrot.lane.b32.xlu0 %v868_v57, %s1817_s11  ;;  %v880_v57 = vrot.slane %v864_v3, %v1939_v34 }
0x1977   :  { %885 = vrot.lane.b32.xlu0 %v876_v61, %s1817_s11  ;;  %v997_v61 = vcombine.high %v995_v58, %v995_v58 }
0x1979   :  { %v1013_v63 = vrot.slane %v997_v61, %v1939_v34 }
0x197b   :  { %1014 = vrot.lane.b32.xlu0 %v1001_v2, %s1817_s11 }
0x197f   :  { %1018 = vrot.lane.b32.xlu0 %v1009_v9, %s1817_s11  ;;  %v1131_v9 = vrot.slane %v1117_v52, %v2223_v45 }
0x1981   :  { %v1133_v11 = vcombine.high %v1131_v9, %v1131_v9 }
0x1983   :  { %1150 = vrot.lane.b32.xlu0 %v1137_v1, %s1817_s11  ;;  %v1141_v1 = vrot.slane %v1131_v9, %v1939_v34  ;;  %v1149_v29 = vrot.slane %v1133_v11, %v1939_v34 }
0x1987   :  { %1154 = vrot.lane.b32.xlu0 %v1145_v16, %s1817_s11  ;;  %v1264_v16 = vrot.slane %v1250_v62, %v2223_v45 }
0x1989   :  { %v1274_v18 = vrot.slane %v1264_v16, %v1939_v34 }
0x198b   :  { %1283 = vrot.lane.b32.xlu0 %v1270_v54, %s1817_s11 }
0x198f   :  { %1287 = vrot.lane.b32.xlu0 %v1278_v19, %s1817_s11  ;;  %v1266_v19 = vcombine.high %v1264_v16, %v1264_v16 }
0x1991   :  { %v1282_v20 = vrot.slane %v1266_v19, %v1939_v34 }
0x1993   :  { %1419 = vrot.lane.b32.xlu0 %v1406_v22, %s1817_s11  ;;  %v1400_v22 = vrot.slane %v1386_v40, %v2223_v45 }
0x1995   :  { %v1410_v24 = vrot.slane %v1400_v22, %v1939_v34  ;;  %v1402_v27 = vcombine.high %v1400_v22, %v1400_v22 }
0x1997   :  { %1423 = vrot.lane.b32.xlu0 %v1414_v25, %s1817_s11  ;;  %v1418_v25 = vrot.slane %v1402_v27, %v1939_v34 }
0x19c9   :  { %v1502_v30 = vpop.permute.xlu0 %1501 }
0x19ca   :  { %v1504_v31 = vadd.f32 %v1502_v30, %v1494_v28 }
0x19cc   :  { %1811 = vtanh.f32 %v1504_v31 }
0x19cd   :  { %v476_v32 = vpop.permute.xlu0 %475 }
0x19ce   :  { %488 = vst.msk [vmem:[%s2534_s6] sm:$0x1] %vm487_vm12, %v476_v32 }
0x19d1   :  { %v480_v36 = vpop.permute.xlu0 %479 }
0x19d2   :  { %490 = vst.msk [vmem:[%s2534_s6 + $0x20] sm:$0x1] %vm487_vm12, %v480_v36 }
0x19d5   :  { %v613_v21 = vpop.permute.xlu0 %612 }
0x19d6   :  { %v1812_v17 = vpop.eup %1811  ;;  %624 = vst.msk [vmem:[%s2534_s6 + $0x1] sm:$0x1] %vm487_vm12, %v613_v21 }
0x19d7   :  { %1507 = vrot.lane.b32.xlu1 %v1812_v17, %s1816_s4 }
0x19d9   :  { %v617_v41 = vpop.permute.xlu0 %616 }
0x19da   :  { %626 = vst.msk [vmem:[%s2534_s6 + $0x21] sm:$0x1] %vm487_vm12, %v617_v41 }
0x19db   :  { %477 = vrot.lane.b32.xlu1 %v466_v42, %s1817_s11 }
0x19dd   :  { %v746_v44 = vpop.permute.xlu0 %745 }
0x19de   :  { %757 = vst.msk [vmem:[%s2534_s6 + $0x2] sm:$0x1] %vm487_vm12, %v746_v44 }
0x19df   :  { %481 = vrot.lane.b32.xlu1 %v474_v55, %s1817_s11 }
0x19e1   :  { %v750_v50 = vpop.permute.xlu0 %749 }
0x19e2   :  { %759 = vst.msk [vmem:[%s2534_s6 + $0x22] sm:$0x1] %vm487_vm12, %v750_v50 }
0x19e3   :  { %614 = vrot.lane.b32.xlu1 %v603_v8, %s1817_s11 }
0x19e5   :  { %v882_v4 = vpop.permute.xlu0 %881 }
0x19e6   :  { %893 = vst.msk [vmem:[%s2534_s6 + $0x3] sm:$0x1] %vm487_vm12, %v882_v4 }
0x19e7   :  { %618 = vrot.lane.b32.xlu1 %v611_v38, %s1817_s11 }
0x19e9   :  { %v886_v0 = vpop.permute.xlu0 %885 }
0x19ea   :  { %895 = vst.msk [vmem:[%s2534_s6 + $0x23] sm:$0x1] %vm487_vm12, %v886_v0 }
0x19eb   :  { %747 = vrot.lane.b32.xlu1 %v736_v13, %s1817_s11 }
0x19ed   :  { %v1015_v47 = vpop.permute.xlu0 %1014 }
0x19ee   :  { %1026 = vst.msk [vmem:[%s2534_s6 + $0x4] sm:$0x1] %vm487_vm12, %v1015_v47 }
0x19ef   :  { %751 = vrot.lane.b32.xlu1 %v744_v49, %s1817_s11 }
0x19f1   :  { %v1019_v23 = vpop.permute.xlu0 %1018 }
0x19f2   :  { %1028 = vst.msk [vmem:[%s2534_s6 + $0x24] sm:$0x1] %vm487_vm12, %v1019_v23 }
0x19f3   :  { %883 = vrot.lane.b32.xlu1 %v872_v53, %s1817_s11 }
0x19f5   :  { %v1151_v56 = vpop.permute.xlu0 %1150 }
0x19f6   :  { %1162 = vst.msk [vmem:[%s2534_s6 + $0x5] sm:$0x1] %vm487_vm12, %v1151_v56 }
0x19f7   :  { %887 = vrot.lane.b32.xlu1 %v880_v57, %s1817_s11 }
0x19f9   :  { %v1155_v59 = vpop.permute.xlu0 %1154 }
0x19fa   :  { %1164 = vst.msk [vmem:[%s2534_s6 + $0x25] sm:$0x1] %vm487_vm12, %v1155_v59 }
0x19fb   :  { %1016 = vrot.lane.b32.xlu1 %v1005_v60, %s1817_s11 }
0x19fd   :  { %v1284_v2 = vpop.permute.xlu0 %1283 }
0x19fe   :  { %1295 = vst.msk [vmem:[%s2534_s6 + $0x6] sm:$0x1] %vm487_vm12, %v1284_v2 }
0x19ff   :  { %1020 = vrot.lane.b32.xlu1 %v1013_v63, %s1817_s11 }
0x1a01   :  { %v1288_v10 = vpop.permute.xlu0 %1287 }
0x1a02   :  { %1297 = vst.msk [vmem:[%s2534_s6 + $0x26] sm:$0x1] %vm487_vm12, %v1288_v10 }
0x1a03   :  { %1152 = vrot.lane.b32.xlu1 %v1141_v1, %s1817_s11 }
0x1a05   :  { %v1420_v12 = vpop.permute.xlu0 %1419 }
0x1a06   :  { %1431 = vst.msk [vmem:[%s2534_s6 + $0x7] sm:$0x1] %vm487_vm12, %v1420_v12 }
0x1a07   :  { %1156 = vrot.lane.b32.xlu1 %v1149_v29, %s1817_s11 }
0x1a09   :  { %v1424_v54 = vpop.permute.xlu0 %1423 }
0x1a0a   :  { %1433 = vst.msk [vmem:[%s2534_s6 + $0x27] sm:$0x1] %vm487_vm12, %v1424_v54 }
0x1a0b   :  { %1285 = vrot.lane.b32.xlu1 %v1274_v18, %s1817_s11 }
0x1a0f   :  { %1289 = vrot.lane.b32.xlu1 %v1282_v20, %s1817_s11 }
0x1a13   :  { %1421 = vrot.lane.b32.xlu1 %v1410_v24, %s1817_s11 }
0x1a17   :  { %1425 = vrot.lane.b32.xlu1 %v1418_v25, %s1817_s11 }
0x1a49   :  { %v1508_v26 = vpop.permute.xlu1 %1507 }
0x1a4a   :  { %v1510_v28 = vmul.f32 %v2229_v46, %v1508_v26 }
0x1a4c   :  { %v1518_v30 = vrot.slane %v1510_v28, %v2223_v45 }
0x1a4d   :  { %v478_v31 = vpop.permute.xlu1 %477 }
0x1a4e   :  { %v1519_v32 = vcombine.high %v1518_v30, %v1518_v30  ;;  %v1526_v35 = vrot.slane %v1518_v30, %v2223_v45  ;;  %489 = vst.msk [vmem:[%s2534_s6 + $0x10] sm:$0x1] %vm487_vm12, %v478_v31 }
0x1a50   :  { %v1539_v36 = vrot.slane %v1526_v35, %v1939_v34  ;;  %v1533_v21 = vrot.slane %v1519_v32, %v2223_v45  ;;  %v1534_v37 = vcombine.high %v1526_v35, %v1526_v35 }
0x1a51   :  { %v482_v17 = vpop.permute.xlu1 %481 }
0x1a52   :  { %491 = vst.msk [vmem:[%s2534_s6 + $0x30] sm:$0x1] %vm487_vm12, %v482_v17  ;;  %1552 = vrot.lane.b32.xlu0 %v1539_v36, %s1817_s11  ;;  %v1543_v46 = vrot.slane %v1533_v21, %v1939_v34  ;;  %v1535_v39 = vcombine.high %v1533_v21, %v1533_v21  ;;  %v1547_v41 = vrot.slane %v1534_v37, %v1939_v34 }
0x1a54   :  { %1554 = vrot.lane.b32.xlu1 %v1543_v46, %s1817_s11  ;;  %v1551_v45 = vrot.slane %v1535_v39, %v1939_v34 }
0x1a55   :  { %v615_v42 = vpop.permute.xlu1 %614 }
0x1a56   :  { %625 = vst.msk [vmem:[%s2534_s6 + $0x11] sm:$0x1] %vm487_vm12, %v615_v42  ;;  %1556 = vrot.lane.b32.xlu0 %v1547_v41, %s1817_s11 }
0x1a58   :  { %1558 = vrot.lane.b32.xlu1 %v1551_v45, %s1817_s11 }
0x1a59   :  { %v619_v43 = vpop.permute.xlu1 %618 }
0x1a5a   :  { %627 = vst.msk [vmem:[%s2534_s6 + $0x31] sm:$0x1] %vm487_vm12, %v619_v43 }
0x1a5d   :  { %v748_v44 = vpop.permute.xlu1 %747 }
0x1a5e   :  { %758 = vst.msk [vmem:[%s2534_s6 + $0x12] sm:$0x1] %vm487_vm12, %v748_v44 }
0x1a61   :  { %v752_v55 = vpop.permute.xlu1 %751 }
0x1a62   :  { %760 = vst.msk [vmem:[%s2534_s6 + $0x32] sm:$0x1] %vm487_vm12, %v752_v55 }
0x1a65   :  { %v884_v34 = vpop.permute.xlu1 %883 }
0x1a66   :  { %894 = vst.msk [vmem:[%s2534_s6 + $0x13] sm:$0x1] %vm487_vm12, %v884_v34 }
0x1a69   :  { %v888_v48 = vpop.permute.xlu1 %887 }
0x1a6a   :  { %896 = vst.msk [vmem:[%s2534_s6 + $0x33] sm:$0x1] %vm487_vm12, %v888_v48 }
0x1a6d   :  { %v1017_v7 = vpop.permute.xlu1 %1016 }
0x1a6e   :  { %1027 = vst.msk [vmem:[%s2534_s6 + $0x14] sm:$0x1] %vm487_vm12, %v1017_v7 }
0x1a71   :  { %v1021_v50 = vpop.permute.xlu1 %1020 }
0x1a72   :  { %1029 = vst.msk [vmem:[%s2534_s6 + $0x34] sm:$0x1] %vm487_vm12, %v1021_v50 }
0x1a75   :  { %v1153_v8 = vpop.permute.xlu1 %1152 }
0x1a76   :  { %1163 = vst.msk [vmem:[%s2534_s6 + $0x15] sm:$0x1] %vm487_vm12, %v1153_v8 }
0x1a79   :  { %v1157_v33 = vpop.permute.xlu1 %1156 }
0x1a7a   :  { %1165 = vst.msk [vmem:[%s2534_s6 + $0x35] sm:$0x1] %vm487_vm12, %v1157_v33 }
0x1a7d   :  { %v1286_v4 = vpop.permute.xlu1 %1285 }
0x1a7e   :  { %1296 = vst.msk [vmem:[%s2534_s6 + $0x16] sm:$0x1] %vm487_vm12, %v1286_v4 }
0x1a81   :  { %v1290_v38 = vpop.permute.xlu1 %1289 }
0x1a82   :  { %1298 = vst.msk [vmem:[%s2534_s6 + $0x36] sm:$0x1] %vm487_vm12, %v1290_v38 }
0x1a85   :  { %v1422_v5 = vpop.permute.xlu1 %1421 }
0x1a86   :  { %1432 = vst.msk [vmem:[%s2534_s6 + $0x17] sm:$0x1] %vm487_vm12, %v1422_v5 }
0x1a89   :  { %v1426_v6 = vpop.permute.xlu1 %1425 }
0x1a8a   :  { %1434 = vst.msk [vmem:[%s2534_s6 + $0x37] sm:$0x1] %vm487_vm12, %v1426_v6 }
0x1ac4   :  { %v1553_v0 = vpop.permute.xlu0 %1552 }
0x1ac5   :  { %1564 = vst.msk [vmem:[%s2534_s6 + $0x8] sm:$0x1] %vm487_vm12, %v1553_v0 }
0x1ac6   :  { %v1555_v13 = vpop.permute.xlu1 %1554 }
0x1ac7   :  { %1565 = vst.msk [vmem:[%s2534_s6 + $0x18] sm:$0x1] %vm487_vm12, %v1555_v13 }
0x1ac8   :  { %v1557_v14 = vpop.permute.xlu0 %1556 }
0x1ac9   :  { %1566 = vst.msk [vmem:[%s2534_s6 + $0x28] sm:$0x1] %vm487_vm12, %v1557_v14 }
0x1aca   :  { %v1559_v47 = vpop.permute.xlu1 %1558 }
0x1acb   :  { %1567 = vst.msk [vmem:[%s2534_s6 + $0x38] sm:$0x1] %vm487_vm12, %v1559_v47 }

</bundles_post_ra>
